<compile_context>
chip_gen: v7x
topology: tpu7x:2x2x1
jax: 0.10.0
libtpu: 0.0.40
codegen_flags: <defaults>
</compile_context>

<pallas_src>
import functools

import jax
import jax.numpy as jnp
from jax import lax
from jax.experimental import pallas as pl
from jax.experimental.pallas import tpu as pltpu

EPS = 1e-3
_LANE = 128
_VMEM_LIMIT = 32 * 1024 * 1024  # safe on v5e/v6e/v7x (<= physical on all gens)


def _round_up(x, m):
    return (x + m - 1) // m * m


def _pick_images_per_step(n, rows_per_image, max_rows_per_step):
    """Largest divisor of n keeping the per-step row tile near the target."""
    nb = 1
    for d in range(1, n + 1):
        if n % d == 0 and d * rows_per_image <= max(max_rows_per_step,
                                                    rows_per_image):
            nb = d
    return nb


def _make_conv_stats_kernel(nb, r_in_pad, r_out_pad, wp, kh, kw, ho, wo):
    """Pass 1: shifted-tap conv accumulation + masked sum / sum-of-squares."""
    valid_rows = ho * wp

    def kernel(x_ref, w_ref, y_ref, stats_ref):
        # x_ref: (nb*r_in_pad, Cin) bf16  -- nb flattened padded images
        # w_ref: (kh*kw, Cin, Cout_pad) bf16
        # y_ref: (nb*r_out_pad, Cout_pad) f32 (conv output on padded-width grid)
        # stats_ref: (1, 2, Cout_pad) f32 (per-tile sum, sum of squares)
        c = y_ref.shape[1]
        # validity mask on the padded-width row grid: drop the (kw-1) junk
        # columns and the sublane-padding rows from the BN statistics.
        row = lax.broadcasted_iota(jnp.int32, (r_out_pad, 1), 0)
        valid = jnp.logical_and(row < valid_rows, (row % wp) < wo)

        s1 = jnp.zeros((1, c), jnp.float32)
        s2 = jnp.zeros((1, c), jnp.float32)
        for j in range(nb):                       # static, small
            base = j * r_in_pad
            acc = jnp.zeros((r_out_pad, c), jnp.float32)
            for di in range(kh):                  # static tap loop (<= 9 taps)
                for dj in range(kw):
                    t = di * kw + dj
                    off = base + di * wp + dj     # static row shift
                    xs = x_ref[off:off + r_out_pad, :]
                    acc = acc + jnp.dot(xs, w_ref[t],
                                        preferred_element_type=jnp.float32)
            y_ref[j * r_out_pad:(j + 1) * r_out_pad, :] = acc
            ym = jnp.where(valid, acc, 0.0)
            s1 = s1 + jnp.sum(ym, axis=0, keepdims=True)
            s2 = s2 + jnp.sum(ym * acc, axis=0, keepdims=True)
        stats_ref[...] = jnp.concatenate([s1, s2], axis=0).reshape(1, 2, c)

    return kernel


def _scale_bias_kernel(y_ref, scale_ref, bias_ref, o_ref):
    """Pass 2: folded BatchNorm affine -> one multiply-add per element."""
    o_ref[...] = y_ref[...] * scale_ref[...] + bias_ref[...]


def conv2d_bn_pallas(x, weight, gamma, beta, *, padding=0, stride=1,
                     max_rows_per_step=512):
    """x: (N, Cin, H, W) f32; weight: (Cout, Cin, kh, kw) f32; gamma/beta (Cout,)."""
    assert stride == 1, "PVNetwork only uses stride=1"   # TODO(synk): stride>1
    n, cin, h, w = x.shape
    cout, cin_w, kh, kw = weight.shape
    assert cin == cin_w, "groups != 1 not supported"     # TODO(synk): grouped conv
    p = padding
    hp, wp = h + 2 * p, w + 2 * p
    ho, wo = hp - kh + 1, wp - kw + 1
    assert ho > 0 and wo > 0

    # Row geometry: output lives on the padded-width (wp) grid so every tap is
    # a contiguous row-shifted matmul; junk columns are masked out of the BN
    # stats and sliced off afterwards.
    r_out = ho * wp
    r_out_pad = _round_up(r_out, 8)                  # f32 output sublanes
    max_off = (kh - 1) * wp + (kw - 1)
    r_in_pad = _round_up(r_out_pad + max_off, 16)    # bf16 input sublanes
    cout_pad = _round_up(cout, _LANE)                # lane-dense channels

    # ---- glue: cheap layout ops only (no 9x data duplication) ----
    x_nhwc = jnp.transpose(x, (0, 2, 3, 1))
    x_sp = jnp.pad(x_nhwc, ((0, 0), (p, p), (p, p), (0, 0)))
    x_rows = x_sp.reshape(n, hp * wp, cin)
    x_rows = jnp.pad(x_rows, ((0, 0), (0, r_in_pad - hp * wp), (0, 0)))
    x_rows = x_rows.reshape(n * r_in_pad, cin).astype(jnp.bfloat16)

    w_taps = jnp.transpose(weight, (2, 3, 1, 0)).reshape(kh * kw, cin, cout)
    w_taps = jnp.pad(w_taps, ((0, 0), (0, 0), (0, cout_pad - cout)))
    w_taps = w_taps.astype(jnp.bfloat16)

    nb = _pick_images_per_step(n, r_out_pad, max_rows_per_step)
    g = n // nb

    # ---- pass 1: conv (bf16 MXU, f32 acc) + per-tile BN partial sums ----
    kernel_a = _make_conv_stats_kernel(nb, r_in_pad, r_out_pad, wp, kh, kw,
                                       ho, wo)
    flops_a = 2 * n * r_out_pad * cin * kh * kw * cout_pad
    bytes_a = (x_rows.size * 2 + w_taps.size * 2
               + n * r_out_pad * cout_pad * 4 + g * 2 * cout_pad * 4)
    y, stats = pl.pallas_call(
        kernel_a,
        out_shape=(
            jax.ShapeDtypeStruct((n * r_out_pad, cout_pad), jnp.float32),
            jax.ShapeDtypeStruct((g, 2, cout_pad), jnp.float32),
        ),
        grid=(g,),
        in_specs=[
            pl.BlockSpec((nb * r_in_pad, cin), lambda i: (i, 0)),
            pl.BlockSpec((kh * kw, cin, cout_pad), lambda i: (0, 0, 0)),
        ],
        out_specs=(
            pl.BlockSpec((nb * r_out_pad, cout_pad), lambda i: (i, 0)),
            pl.BlockSpec((1, 2, cout_pad), lambda i: (i, 0, 0)),
        ),
        compiler_params=pltpu.CompilerParams(
            dimension_semantics=("parallel",),
            vmem_limit_bytes=_VMEM_LIMIT),
        cost_estimate=pl.CostEstimate(
            flops=flops_a, transcendentals=0, bytes_accessed=bytes_a),
    )(x_rows, w_taps)

    # ---- tiny BN reduction over tiles + affine fold (scale/bias) ----
    m_count = n * ho * wo
    s = jnp.sum(stats, axis=0)                       # (2, Cout_pad)
    mean = s[0] / m_count
    var = jnp.maximum(s[1] / m_count - mean * mean, 0.0)   # biased batch var
    gamma_p = jnp.pad(gamma.astype(jnp.float32), (0, cout_pad - cout),
                      constant_values=1.0)
    beta_p = jnp.pad(beta.astype(jnp.float32), (0, cout_pad - cout))
    inv = lax.rsqrt(var + EPS)
    scale = (gamma_p * inv).reshape(1, cout_pad)
    bias = (beta_p - mean * gamma_p * inv).reshape(1, cout_pad)

    # ---- pass 2: single multiply-add normalize, lane-dense stores ----
    flops_b = 2 * n * r_out_pad * cout_pad
    bytes_b = 2 * n * r_out_pad * cout_pad * 4 + 2 * cout_pad * 4
    out_flat = pl.pallas_call(
        _scale_bias_kernel,
        out_shape=jax.ShapeDtypeStruct((n * r_out_pad, cout_pad), jnp.float32),
        grid=(g,),
        in_specs=[
            pl.BlockSpec((nb * r_out_pad, cout_pad), lambda i: (i, 0)),
            pl.BlockSpec((1, cout_pad), lambda i: (0, 0)),
            pl.BlockSpec((1, cout_pad), lambda i: (0, 0)),
        ],
        out_specs=pl.BlockSpec((nb * r_out_pad, cout_pad), lambda i: (i, 0)),
        compiler_params=pltpu.CompilerParams(
            dimension_semantics=("parallel",),
            vmem_limit_bytes=_VMEM_LIMIT),
        cost_estimate=pl.CostEstimate(
            flops=flops_b, transcendentals=0, bytes_accessed=bytes_b),
    )(y, scale, bias)

    # ---- glue: drop pad rows / junk columns / pad channels, back to NCHW ----
    out = out_flat.reshape(n, r_out_pad, cout_pad)[:, :ho * wp, :]
    out = out.reshape(n, ho, wp, cout_pad)[:, :, :wo, :cout]
    return jnp.transpose(out, (0, 3, 1, 2))


def _reference(x, weight, gamma, beta, *, padding, stride=1):
    y = lax.conv_general_dilated(
        x, weight, window_strides=(stride, stride),
        padding=((padding, padding), (padding, padding)),
        dimension_numbers=("NCHW", "OIHW", "NCHW"),
        precision=lax.Precision.HIGHEST)
    mean = jnp.mean(y, axis=(0, 2, 3), keepdims=True)
    var = jnp.mean((y - mean) ** 2, axis=(0, 2, 3), keepdims=True)
    y_hat = (y - mean) * lax.rsqrt(var + EPS)
    return y_hat * gamma.reshape(1, -1, 1, 1) + beta.reshape(1, -1, 1, 1)


if __name__ == "__main__":
    key = jax.random.PRNGKey(0)

    def run_case(name, k, *, n, cin, cout, ksize, pad, max_rows_per_step=512):
        kh_, kw_ = ksize if isinstance(ksize, tuple) else (ksize, ksize)
        kx, kwt, kg, kb = jax.random.split(k, 4)
        x = jax.random.normal(kx, (n, cin, 9, 9), dtype=jnp.float32)
        weight = 0.1 * jax.random.normal(kwt, (cout, cin, kh_, kw_),
                                         dtype=jnp.float32)
        gamma = 1.0 + 0.1 * jax.random.normal(kg, (cout,), dtype=jnp.float32)
        beta = 0.1 * jax.random.normal(kb, (cout,), dtype=jnp.float32)

        run = jax.jit(functools.partial(conv2d_bn_pallas, padding=pad,
                                        max_rows_per_step=max_rows_per_step))
        out = run(x, weight, gamma, beta)
        jax.block_until_ready(out)

        # kernel feeds the MXU bf16 operands -> compare against a reference
        # that sees the same bf16-rounded conv inputs (f32 conv, f32 BN).
        xr = x.astype(jnp.bfloat16).astype(jnp.float32)
        wr = weight.astype(jnp.bfloat16).astype(jnp.float32)
        ref = _reference(xr, wr, gamma, beta, padding=pad)
        assert out.shape == ref.shape, (name, out.shape, ref.shape)
        err = float(jnp.max(jnp.abs(out - ref)))
        assert err < 1e-3, (name, err)

    k1, k2, k3 = jax.random.split(key, 3)
    # The three conv flavours PVNetwork uses (KatagoBlock / heads), 9x9 board.
    run_case("conv3x3", k1, n=4, cin=4, cout=8, ksize=3, pad=1,
             max_rows_per_step=128)   # small tile target -> multi-step grid
    run_case("conv1x1", k2, n=4, cin=8, cout=6, ksize=1, pad=0)
    run_case("conv9x1", k3, n=2, cin=8, cout=8, ksize=(9, 1), pad=0)
    print("KERNEL_OK")
</pallas_src>

<mosaic_0001>
module attributes {stable_mosaic.version = 11 : i64} {
  func.func @kernel(%arg0: i32, %arg1: memref<128x4xbf16, #tpu.memory_space<vmem>>, %arg2: memref<9x4x128xbf16, #tpu.memory_space<vmem>>, %arg3: memref<104x128xf32, #tpu.memory_space<vmem>>, %arg4: memref<1x2x128xf32, #tpu.memory_space<vmem>>) attributes {dimension_semantics = [#tpu.dimension_semantics<parallel>], iteration_bounds = array<i64: 4>, scalar_prefetch = 0 : i64, scratch_operands = 0 : i64, tpu.core_type = #tpu.core_type<tc>, window_params = [{transform_indices = @transform_0, window_bounds = array<i64: 128, 4>}, {pipeline_mode = #tpu.pipeline_mode<synchronous>, transform_indices = @transform_1, window_bounds = array<i64: 9, 4, 128>}, {transform_indices = @transform_2, window_bounds = array<i64: 104, 128>}, {transform_indices = @transform_3, window_bounds = array<i64: 1, 2, 128>}]} {
    %0 = tpu.iota {dimensions = array<i32: 0>} : vector<104x1xi32>
    %c99_i32 = arith.constant 99 : i32
    %1 = vector.broadcast %c99_i32 : i32 to vector<104x1xi32>
    %2 = arith.cmpi slt, %0, %1 : vector<104x1xi32>
    %c11_i32 = arith.constant 11 : i32
    %c0_i32 = arith.constant 0 : i32
    %3 = arith.cmpi eq, %c11_i32, %c0_i32 : i32
    %c1_i32 = arith.constant 1 : i32
    %4 = arith.select %3, %c1_i32, %c11_i32 : i32
    %5 = vector.broadcast %4 : i32 to vector<104x1xi32>
    %6 = arith.remsi %0, %5 : vector<104x1xi32>
    %c0_i32_0 = arith.constant 0 : i32
    %7 = vector.broadcast %c0_i32_0 : i32 to vector<104x1xi32>
    %8 = arith.cmpi ne, %6, %7 : vector<104x1xi32>
    %c0_i32_1 = arith.constant 0 : i32
    %9 = vector.broadcast %c0_i32_1 : i32 to vector<104x1xi32>
    %10 = arith.cmpi slt, %6, %9 : vector<104x1xi32>
    %c0_i32_2 = arith.constant 0 : i32
    %11 = arith.cmpi slt, %4, %c0_i32_2 : i32
    %12 = vector.broadcast %11 : i1 to vector<104x1xi1>
    %13 = vector.broadcast %12 : vector<104x1xi1> to vector<104x1xi1>
    %14 = arith.xori %10, %13 : vector<104x1xi1>
    %15 = arith.andi %14, %8 : vector<104x1xi1>
    %16 = vector.broadcast %4 : i32 to vector<104x1xi32>
    %17 = arith.addi %6, %16 : vector<104x1xi32>
    %18 = arith.select %15, %17, %6 : vector<104x1xi1>, vector<104x1xi32>
    %c9_i32 = arith.constant 9 : i32
    %19 = vector.broadcast %c9_i32 : i32 to vector<104x1xi32>
    %20 = arith.cmpi slt, %18, %19 : vector<104x1xi32>
    %21 = arith.andi %2, %20 : vector<104x1xi1>
    %cst = arith.constant 0.000000e+00 : f32
    %22 = vector.broadcast %cst : f32 to vector<1x128xf32>
    %cst_3 = arith.constant 0.000000e+00 : f32
    %23 = vector.broadcast %cst_3 : f32 to vector<1x128xf32>
    %cst_4 = arith.constant 0.000000e+00 : f32
    %24 = vector.broadcast %cst_4 : f32 to vector<104x128xf32>
    %c0 = arith.constant 0 : index
    %c0_5 = arith.constant 0 : index
    %25 = vector.load %arg1[%c0, %c0_5] : memref<128x4xbf16, #tpu.memory_space<vmem>>, vector<104x4xbf16>
    %c0_6 = arith.constant 0 : index
    %c0_7 = arith.constant 0 : index
    %c0_8 = arith.constant 0 : index
    %26 = vector.load %arg2[%c0_6, %c0_7, %c0_8] : memref<9x4x128xbf16, #tpu.memory_space<vmem>>, vector<1x4x128xbf16>
    %27 = vector.shape_cast %26 : vector<1x4x128xbf16> to vector<4x128xbf16>
    %cst_9 = arith.constant dense<0.000000e+00> : vector<104x128xf32>
    %28 = tpu.matmul %25, %27, %cst_9 {dimension_numbers = #tpu.dot_dimension_numbers<[1], [0], [0], [1], [0, 0, 1, 1], [], []>} : vector<104x4xbf16>, vector<4x128xbf16>, vector<104x128xf32> -> vector<104x128xf32>
    %29 = arith.addf %24, %28 : vector<104x128xf32>
    %c1 = arith.constant 1 : index
    %c0_10 = arith.constant 0 : index
    %30 = vector.load %arg1[%c1, %c0_10] : memref<128x4xbf16, #tpu.memory_space<vmem>>, vector<104x4xbf16>
    %c1_11 = arith.constant 1 : index
    %c0_12 = arith.constant 0 : index
    %c0_13 = arith.constant 0 : index
    %31 = vector.load %arg2[%c1_11, %c0_12, %c0_13] : memref<9x4x128xbf16, #tpu.memory_space<vmem>>, vector<1x4x128xbf16>
    %32 = vector.shape_cast %31 : vector<1x4x128xbf16> to vector<4x128xbf16>
    %cst_14 = arith.constant dense<0.000000e+00> : vector<104x128xf32>
    %33 = tpu.matmul %30, %32, %cst_14 {dimension_numbers = #tpu.dot_dimension_numbers<[1], [0], [0], [1], [0, 0, 1, 1], [], []>} : vector<104x4xbf16>, vector<4x128xbf16>, vector<104x128xf32> -> vector<104x128xf32>
    %34 = arith.addf %29, %33 : vector<104x128xf32>
    %c2 = arith.constant 2 : index
    %c0_15 = arith.constant 0 : index
    %35 = vector.load %arg1[%c2, %c0_15] : memref<128x4xbf16, #tpu.memory_space<vmem>>, vector<104x4xbf16>
    %c2_16 = arith.constant 2 : index
    %c0_17 = arith.constant 0 : index
    %c0_18 = arith.constant 0 : index
    %36 = vector.load %arg2[%c2_16, %c0_17, %c0_18] : memref<9x4x128xbf16, #tpu.memory_space<vmem>>, vector<1x4x128xbf16>
    %37 = vector.shape_cast %36 : vector<1x4x128xbf16> to vector<4x128xbf16>
    %cst_19 = arith.constant dense<0.000000e+00> : vector<104x128xf32>
    %38 = tpu.matmul %35, %37, %cst_19 {dimension_numbers = #tpu.dot_dimension_numbers<[1], [0], [0], [1], [0, 0, 1, 1], [], []>} : vector<104x4xbf16>, vector<4x128xbf16>, vector<104x128xf32> -> vector<104x128xf32>
    %39 = arith.addf %34, %38 : vector<104x128xf32>
    %c11 = arith.constant 11 : index
    %c0_20 = arith.constant 0 : index
    %40 = vector.load %arg1[%c11, %c0_20] : memref<128x4xbf16, #tpu.memory_space<vmem>>, vector<104x4xbf16>
    %c3 = arith.constant 3 : index
    %c0_21 = arith.constant 0 : index
    %c0_22 = arith.constant 0 : index
    %41 = vector.load %arg2[%c3, %c0_21, %c0_22] : memref<9x4x128xbf16, #tpu.memory_space<vmem>>, vector<1x4x128xbf16>
    %42 = vector.shape_cast %41 : vector<1x4x128xbf16> to vector<4x128xbf16>
    %cst_23 = arith.constant dense<0.000000e+00> : vector<104x128xf32>
    %43 = tpu.matmul %40, %42, %cst_23 {dimension_numbers = #tpu.dot_dimension_numbers<[1], [0], [0], [1], [0, 0, 1, 1], [], []>} : vector<104x4xbf16>, vector<4x128xbf16>, vector<104x128xf32> -> vector<104x128xf32>
    %44 = arith.addf %39, %43 : vector<104x128xf32>
    %c12 = arith.constant 12 : index
    %c0_24 = arith.constant 0 : index
    %45 = vector.load %arg1[%c12, %c0_24] : memref<128x4xbf16, #tpu.memory_space<vmem>>, vector<104x4xbf16>
    %c4 = arith.constant 4 : index
    %c0_25 = arith.constant 0 : index
    %c0_26 = arith.constant 0 : index
    %46 = vector.load %arg2[%c4, %c0_25, %c0_26] : memref<9x4x128xbf16, #tpu.memory_space<vmem>>, vector<1x4x128xbf16>
    %47 = vector.shape_cast %46 : vector<1x4x128xbf16> to vector<4x128xbf16>
    %cst_27 = arith.constant dense<0.000000e+00> : vector<104x128xf32>
    %48 = tpu.matmul %45, %47, %cst_27 {dimension_numbers = #tpu.dot_dimension_numbers<[1], [0], [0], [1], [0, 0, 1, 1], [], []>} : vector<104x4xbf16>, vector<4x128xbf16>, vector<104x128xf32> -> vector<104x128xf32>
    %49 = arith.addf %44, %48 : vector<104x128xf32>
    %c13 = arith.constant 13 : index
    %c0_28 = arith.constant 0 : index
    %50 = vector.load %arg1[%c13, %c0_28] : memref<128x4xbf16, #tpu.memory_space<vmem>>, vector<104x4xbf16>
    %c5 = arith.constant 5 : index
    %c0_29 = arith.constant 0 : index
    %c0_30 = arith.constant 0 : index
    %51 = vector.load %arg2[%c5, %c0_29, %c0_30] : memref<9x4x128xbf16, #tpu.memory_space<vmem>>, vector<1x4x128xbf16>
    %52 = vector.shape_cast %51 : vector<1x4x128xbf16> to vector<4x128xbf16>
    %cst_31 = arith.constant dense<0.000000e+00> : vector<104x128xf32>
    %53 = tpu.matmul %50, %52, %cst_31 {dimension_numbers = #tpu.dot_dimension_numbers<[1], [0], [0], [1], [0, 0, 1, 1], [], []>} : vector<104x4xbf16>, vector<4x128xbf16>, vector<104x128xf32> -> vector<104x128xf32>
    %54 = arith.addf %49, %53 : vector<104x128xf32>
    %c22 = arith.constant 22 : index
    %c0_32 = arith.constant 0 : index
    %55 = vector.load %arg1[%c22, %c0_32] : memref<128x4xbf16, #tpu.memory_space<vmem>>, vector<104x4xbf16>
    %c6 = arith.constant 6 : index
    %c0_33 = arith.constant 0 : index
    %c0_34 = arith.constant 0 : index
    %56 = vector.load %arg2[%c6, %c0_33, %c0_34] : memref<9x4x128xbf16, #tpu.memory_space<vmem>>, vector<1x4x128xbf16>
    %57 = vector.shape_cast %56 : vector<1x4x128xbf16> to vector<4x128xbf16>
    %cst_35 = arith.constant dense<0.000000e+00> : vector<104x128xf32>
    %58 = tpu.matmul %55, %57, %cst_35 {dimension_numbers = #tpu.dot_dimension_numbers<[1], [0], [0], [1], [0, 0, 1, 1], [], []>} : vector<104x4xbf16>, vector<4x128xbf16>, vector<104x128xf32> -> vector<104x128xf32>
    %59 = arith.addf %54, %58 : vector<104x128xf32>
    %c23 = arith.constant 23 : index
    %c0_36 = arith.constant 0 : index
    %60 = vector.load %arg1[%c23, %c0_36] : memref<128x4xbf16, #tpu.memory_space<vmem>>, vector<104x4xbf16>
    %c7 = arith.constant 7 : index
    %c0_37 = arith.constant 0 : index
    %c0_38 = arith.constant 0 : index
    %61 = vector.load %arg2[%c7, %c0_37, %c0_38] : memref<9x4x128xbf16, #tpu.memory_space<vmem>>, vector<1x4x128xbf16>
    %62 = vector.shape_cast %61 : vector<1x4x128xbf16> to vector<4x128xbf16>
    %cst_39 = arith.constant dense<0.000000e+00> : vector<104x128xf32>
    %63 = tpu.matmul %60, %62, %cst_39 {dimension_numbers = #tpu.dot_dimension_numbers<[1], [0], [0], [1], [0, 0, 1, 1], [], []>} : vector<104x4xbf16>, vector<4x128xbf16>, vector<104x128xf32> -> vector<104x128xf32>
    %64 = arith.addf %59, %63 : vector<104x128xf32>
    %c24 = arith.constant 24 : index
    %c0_40 = arith.constant 0 : index
    %65 = vector.load %arg1[%c24, %c0_40] : memref<128x4xbf16, #tpu.memory_space<vmem>>, vector<104x4xbf16>
    %c8 = arith.constant 8 : index
    %c0_41 = arith.constant 0 : index
    %c0_42 = arith.constant 0 : index
    %66 = vector.load %arg2[%c8, %c0_41, %c0_42] : memref<9x4x128xbf16, #tpu.memory_space<vmem>>, vector<1x4x128xbf16>
    %67 = vector.shape_cast %66 : vector<1x4x128xbf16> to vector<4x128xbf16>
    %cst_43 = arith.constant dense<0.000000e+00> : vector<104x128xf32>
    %68 = tpu.matmul %65, %67, %cst_43 {dimension_numbers = #tpu.dot_dimension_numbers<[1], [0], [0], [1], [0, 0, 1, 1], [], []>} : vector<104x4xbf16>, vector<4x128xbf16>, vector<104x128xf32> -> vector<104x128xf32>
    %69 = arith.addf %64, %68 : vector<104x128xf32>
    %c0_44 = arith.constant 0 : index
    %c0_45 = arith.constant 0 : index
    %70 = vector.load %arg3[%c0_44, %c0_45] : memref<104x128xf32, #tpu.memory_space<vmem>>, vector<104x128xf32>
    tpu.vector_store %arg3[%c0_44, %c0_45], %69 {strides = array<i32>} : memref<104x128xf32, #tpu.memory_space<vmem>>, vector<104x128xf32>,
    %cst_46 = arith.constant 0.000000e+00 : f32
    %71 = vector.shape_cast %21 : vector<104x1xi1> to vector<104x1xi1>
    %72 = vector.broadcast %71 : vector<104x1xi1> to vector<104x128xi1>
    %73 = vector.broadcast %cst_46 : f32 to vector<104x128xf32>
    %74 = arith.select %72, %69, %73 : vector<104x128xi1>, vector<104x128xf32>
    %cst_47 = arith.constant dense<0.000000e+00> : vector<128xf32>
    %75 = vector.multi_reduction <add>, %74, %cst_47 [0] : vector<104x128xf32> to vector<128xf32>
    %76 = vector.shape_cast %75 : vector<128xf32> to vector<1x128xf32>
    %77 = arith.addf %22, %76 : vector<1x128xf32>
    %78 = arith.mulf %74, %69 : vector<104x128xf32>
    %cst_48 = arith.constant dense<0.000000e+00> : vector<128xf32>
    %79 = vector.multi_reduction <add>, %78, %cst_48 [0] : vector<104x128xf32> to vector<128xf32>
    %80 = vector.shape_cast %79 : vector<128xf32> to vector<1x128xf32>
    %81 = arith.addf %23, %80 : vector<1x128xf32>
    %82 = tpu.concatenate %77, %81 in 0 : vector<1x128xf32>, vector<1x128xf32> -> vector<2x128xf32>
    %83 = vector.shape_cast %82 : vector<2x128xf32> to vector<1x2x128xf32>
    %c0_49 = arith.constant 0 : index
    %c0_50 = arith.constant 0 : index
    %c0_51 = arith.constant 0 : index
    %84 = vector.load %arg4[%c0_49, %c0_50, %c0_51] : memref<1x2x128xf32, #tpu.memory_space<vmem>>, vector<1x2x128xf32>
    tpu.vector_store %arg4[%c0_49, %c0_50, %c0_51], %83 {strides = array<i32>} : memref<1x2x128xf32, #tpu.memory_space<vmem>>, vector<1x2x128xf32>,
    return
  }
  func.func @transform_0(%arg0: i32) -> (i32, i32) {
    %c0_i32 = arith.constant 0 : i32
    %c0_i32_0 = arith.constant 0 : i32
    return %arg0, %c0_i32 : i32, i32
  }
  func.func @transform_1(%arg0: i32) -> (i32, i32, i32) {
    %c0_i32 = arith.constant 0 : i32
    %c0_i32_0 = arith.constant 0 : i32
    %c0_i32_1 = arith.constant 0 : i32
    %c0_i32_2 = arith.constant 0 : i32
    return %c0_i32, %c0_i32_0, %c0_i32_1 : i32, i32, i32
  }
  func.func @transform_2(%arg0: i32) -> (i32, i32) {
    %c0_i32 = arith.constant 0 : i32
    %c0_i32_0 = arith.constant 0 : i32
    return %arg0, %c0_i32 : i32, i32
  }
  func.func @transform_3(%arg0: i32) -> (i32, i32, i32) {
    %c0_i32 = arith.constant 0 : i32
    %c0_i32_0 = arith.constant 0 : i32
    %c0_i32_1 = arith.constant 0 : i32
    return %arg0, %c0_i32, %c0_i32_0 : i32, i32, i32
  }
}

module attributes {stable_mosaic.version = 11 : i64} {
  func.func @_scale_bias_kernel(%arg0: i32, %arg1: memref<104x128xf32, #tpu.memory_space<vmem>>, %arg2: memref<1x128xf32, #tpu.memory_space<vmem>>, %arg3: memref<1x128xf32, #tpu.memory_space<vmem>>, %arg4: memref<104x128xf32, #tpu.memory_space<vmem>>) attributes {dimension_semantics = [#tpu.dimension_semantics<parallel>], iteration_bounds = array<i64: 4>, scalar_prefetch = 0 : i64, scratch_operands = 0 : i64, tpu.core_type = #tpu.core_type<tc>, window_params = [{transform_indices = @transform_0, window_bounds = array<i64: 104, 128>}, {pipeline_mode = #tpu.pipeline_mode<synchronous>, transform_indices = @transform_1, window_bounds = array<i64: 1, 128>}, {pipeline_mode = #tpu.pipeline_mode<synchronous>, transform_indices = @transform_2, window_bounds = array<i64: 1, 128>}, {transform_indices = @transform_3, window_bounds = array<i64: 104, 128>}]} {
    %c0 = arith.constant 0 : index
    %c0_0 = arith.constant 0 : index
    %0 = vector.load %arg1[%c0, %c0_0] : memref<104x128xf32, #tpu.memory_space<vmem>>, vector<104x128xf32>
    %c0_1 = arith.constant 0 : index
    %c0_2 = arith.constant 0 : index
    %1 = vector.load %arg2[%c0_1, %c0_2] : memref<1x128xf32, #tpu.memory_space<vmem>>, vector<1x128xf32>
    %2 = vector.broadcast %1 : vector<1x128xf32> to vector<104x128xf32>
    %3 = arith.mulf %0, %2 : vector<104x128xf32>
    %c0_3 = arith.constant 0 : index
    %c0_4 = arith.constant 0 : index
    %4 = vector.load %arg3[%c0_3, %c0_4] : memref<1x128xf32, #tpu.memory_space<vmem>>, vector<1x128xf32>
    %5 = vector.broadcast %4 : vector<1x128xf32> to vector<104x128xf32>
    %6 = arith.addf %3, %5 : vector<104x128xf32>
    %c0_5 = arith.constant 0 : index
    %c0_6 = arith.constant 0 : index
    %7 = vector.load %arg4[%c0_5, %c0_6] : memref<104x128xf32, #tpu.memory_space<vmem>>, vector<104x128xf32>
    tpu.vector_store %arg4[%c0_5, %c0_6], %6 {strides = array<i32>} : memref<104x128xf32, #tpu.memory_space<vmem>>, vector<104x128xf32>,
    return
  }
  func.func @transform_0(%arg0: i32) -> (i32, i32) {
    %c0_i32 = arith.constant 0 : i32
    %c0_i32_0 = arith.constant 0 : i32
    return %arg0, %c0_i32 : i32, i32
  }
  func.func @transform_1(%arg0: i32) -> (i32, i32) {
    %c0_i32 = arith.constant 0 : i32
    %c0_i32_0 = arith.constant 0 : i32
    %c0_i32_1 = arith.constant 0 : i32
    return %c0_i32, %c0_i32_0 : i32, i32
  }
  func.func @transform_2(%arg0: i32) -> (i32, i32) {
    %c0_i32 = arith.constant 0 : i32
    %c0_i32_0 = arith.constant 0 : i32
    %c0_i32_1 = arith.constant 0 : i32
    return %c0_i32, %c0_i32_0 : i32, i32
  }
  func.func @transform_3(%arg0: i32) -> (i32, i32) {
    %c0_i32 = arith.constant 0 : i32
    %c0_i32_0 = arith.constant 0 : i32
    return %arg0, %c0_i32 : i32, i32
  }
}

</mosaic_0001>

<bundles_post_ra>
// kernel: conv2d_bn_pallas.3
= control target key start
LH: loop header
LB: loop body
LE: loop exit
PB: predicated region body
PF: predicated region fallthrough
CT: control target
= control target key end

     0   :  { %s343_s12 = smov 0   ;;  %s381_s0 = inlined_call_operand.vmem [shape: f32[416,128], index: 0, kind: input, shape index: {}]   ;;  %s382_s1 = inlined_call_operand.vmem [shape: f32[1,128], index: 1, kind: input, shape index: {}]   ;;  %s383_s2 = inlined_call_operand.vmem [shape: f32[1,128], index: 2, kind: input, shape index: {}]   ;;  %s384_s3 = inlined_call_operand.vmem [shape: f32[416,128], index: 3, kind: output, shape index: {}]  }
   0x1 LB: > { %s296_s13 = sadd.s32 4294967295, %s321_s12   ;;  %p300_p0 = scmp.ge.s32.totalorder %s321_s12, 1  ;;  %s321_s12 = sphi %s343_s12, %s13_s12  }
   0x2   : > { %p138_p1 = scmp.lt.s32.totalorder %s321_s12, 5 }
   0x4   : > { %p139_p2 = pnand %p300_p0, %p138_p1 }
   0x5   : > { %s162_s14 = smul.u32 (!%p139_p2), 13, %s296_s13  ;;  %v303_v0 = vld [vmem:[%s382_s1] ss:$0 sm:$0xff] (!%p139_p2) }
   0x6   : > { %142 = sbr.rel (%p139_p2) target bundleno = 28 (0x1c), region = 32  ;;  %v304_v1 = vld [vmem:[%s383_s2] ss:$0 sm:$0xff] (!%p139_p2) }
   0x7   : > { %p163_p3 = scmp.lt.s32.totalorder (!%p139_p2), %s162_s14, 51 }
   0xd   : > { %s386_s14 = smov (!%p163_p3, %s162_s14), 51 }
   0xe   : > { %s301_s15 = sshll.u32 %s386_s14, 3 }
   0xf   : > { %s166_s20 = scalar_lea.vmem %s381_s0, %s301_s15  ;;  %s363_s25 = scalar_lea.vmem %s384_s3, %s301_s15 }
  0x10   : > { %v174_v2 = vld [vmem:[%s166_s20] sm:$0xff]  ;;  %v175_v3 = vld [vmem:[%s166_s20 + $0x8] sm:$0xff]  ;;  %v176_v4 = vld [vmem:[%s166_s20 + $0x10] sm:$0xff] }
  0x11   : > { %v194_v5 = vmul.f32 %v303_v0, %v174_v2  ;;  %v195_v6 = vmul.f32 %v303_v0, %v175_v3  ;;  %v196_v7 = vmul.f32 %v303_v0, %v176_v4  ;;  %v177_v8 = vld [vmem:[%s166_s20 + $0x18] sm:$0xff]  ;;  %v178_v9 = vld [vmem:[%s166_s20 + $0x20] sm:$0xff]  ;;  %v179_v10 = vld [vmem:[%s166_s20 + $0x28] sm:$0xff] }
  0x12   : > { %v197_v11 = vmul.f32 %v303_v0, %v177_v8  ;;  %v198_v12 = vmul.f32 %v303_v0, %v178_v9  ;;  %v199_v13 = vmul.f32 %v303_v0, %v179_v10  ;;  %v180_v14 = vld [vmem:[%s166_s20 + $0x30] sm:$0xff]  ;;  %v181_v15 = vld [vmem:[%s166_s20 + $0x38] sm:$0xff]  ;;  %v182_v16 = vld [vmem:[%s166_s20 + $0x40] sm:$0xff] }
  0x13   : > { %v214_v17 = vadd.f32 %v304_v1, %v194_v5  ;;  %v215_v18 = vadd.f32 %v304_v1, %v195_v6  ;;  %v216_v19 = vadd.f32 %v304_v1, %v196_v7  ;;  %v200_v20 = vmul.f32 %v303_v0, %v180_v14  ;;  %v183_v21 = vld [vmem:[%s166_s20 + $0x48] sm:$0xff]  ;;  %v184_v22 = vld [vmem:[%s166_s20 + $0x50] sm:$0xff]  ;;  %v185_v23 = vld [vmem:[%s166_s20 + $0x58] sm:$0xff] }
  0x14   : > { %v217_v24 = vadd.f32 %v304_v1, %v197_v11  ;;  %v218_v25 = vadd.f32 %v304_v1, %v198_v12  ;;  %v219_v26 = vadd.f32 %v304_v1, %v199_v13  ;;  %v201_v27 = vmul.f32 %v303_v0, %v181_v15  ;;  %v186_v28 = vld [vmem:[%s166_s20 + $0x60] sm:$0xff] }
  0x15   : > { %227 = vst [vmem:[%s363_s25] sm:$0xff] %v214_v17  ;;  %228 = vst [vmem:[%s363_s25 + $0x8] sm:$0xff] %v215_v18  ;;  %v220_v29 = vadd.f32 %v304_v1, %v200_v20  ;;  %v202_v30 = vmul.f32 %v303_v0, %v182_v16  ;;  %v203_v31 = vmul.f32 %v303_v0, %v183_v21 }
  0x16   : > { %229 = vst [vmem:[%s363_s25 + $0x10] sm:$0xff] %v216_v19  ;;  %v204_v32 = vmul.f32 %v303_v0, %v184_v22  ;;  %230 = vst [vmem:[%s363_s25 + $0x18] sm:$0xff] %v217_v24  ;;  %v221_v33 = vadd.f32 %v304_v1, %v201_v27  ;;  %v205_v34 = vmul.f32 %v303_v0, %v185_v23 }
  0x17   : > { %231 = vst [vmem:[%s363_s25 + $0x20] sm:$0xff] %v218_v25  ;;  %232 = vst [vmem:[%s363_s25 + $0x28] sm:$0xff] %v219_v26  ;;  %v206_v35 = vmul.f32 %v303_v0, %v186_v28  ;;  %v222_v36 = vadd.f32 %v304_v1, %v202_v30  ;;  %v223_v37 = vadd.f32 %v304_v1, %v203_v31 }
  0x18   : > { %233 = vst [vmem:[%s363_s25 + $0x30] sm:$0xff] %v220_v29  ;;  %v224_v38 = vadd.f32 %v304_v1, %v204_v32  ;;  %234 = vst [vmem:[%s363_s25 + $0x38] sm:$0xff] %v221_v33  ;;  %v225_v39 = vadd.f32 %v304_v1, %v205_v34 }
  0x19   : > { %v226_v40 = vadd.f32 %v304_v1, %v206_v35  ;;  %235 = vst [vmem:[%s363_s25 + $0x40] sm:$0xff] %v222_v36  ;;  %236 = vst [vmem:[%s363_s25 + $0x48] sm:$0xff] %v223_v37 }
  0x1a   : > { %237 = vst [vmem:[%s363_s25 + $0x50] sm:$0xff] %v224_v38  ;;  %238 = vst [vmem:[%s363_s25 + $0x58] sm:$0xff] %v225_v39 }
  0x1b   : > { %239 = vst [vmem:[%s363_s25 + $0x60] sm:$0xff] %v226_v40 }
  0x1c PF: > { %s13_s12 = sadd.s32 1, %s321_s12  }
  0x1d   : > { %p10_p4 = scmp.ge.s32.totalorder %s13_s12, 6  }
  0x1f   :  { %12 = sbr.rel (!%p10_p4) target bundleno = 1 (0x1), region = 62 }

// kernel: conv2d_bn_pallas.2
= control target key start
LH: loop header
LB: loop body
LE: loop exit
PB: predicated region body
PF: predicated region fallthrough
CT: control target
= control target key end

     0   :  { %s2952_s12 = smov 0   ;;  %s3791_s0 = inlined_call_operand.vmem [shape: bf16[512,4], index: 0, kind: input, shape index: {}]   ;;  %s3792_s1 = inlined_call_operand.vmem [shape: bf16[9,4,128], index: 1, kind: input, shape index: {}]   ;;  %s3793_s2 = inlined_call_operand.vmem [shape: f32[416,128], index: 2, kind: output, shape index: {0}]   ;;  %s3794_s3 = inlined_call_operand.vmem [shape: f32[4,2,128], index: 3, kind: output, shape index: {1}]  }
   0x1 LB: > { %s2958_s13 = sadd.s32 4294967295, %s2928_s12   ;;  %p2189_p0 = scmp.ge.s32.totalorder %s2928_s12, 1  ;;  %s2928_s12 = sphi %s2952_s12, %s14_s12  }
   0x2   : > { %p141_p1 = scmp.lt.s32.totalorder %s2928_s12, 5 }
   0x4   : > { %p142_p2 = pnand %p2189_p0, %p141_p1 }
   0x5   : > { %vm577_vm0 = vcmask (!%p142_p2), 1041408   ;;  %v2241_v0 = vld [vmem:[%s3792_s1 + $0x8] sm:$0x3] (!%p142_p2)  ;;  %s2190_s16 = sshll.u32 (!%p142_p2), %s2958_s13, 4  ;;  %v2930_v1 = vmov (!%p142_p2), 0.0   ;;  %vm2931_vm1 = vmmov (!%p142_p2), 0  }
   0x6   : > { %145 = sbr.rel (%p142_p2) target bundleno = 504 (0x1f8), region = 28  ;;  %2492 = vmatprep.subr.bf16.mxu0 (!%p142_p2), %v2930_v1  ;;  %v2968_v2 = vsel (!%p142_p2), %vm577_vm0, %v2241_v0, 0  ;;  %2494 = vmatprep.mubr.msk.bf16.mxu0 (!%p142_p2), %vm2931_vm1, %v2930_v1  ;;  %p170_p3 = scmp.lt.s32.totalorder (!%p142_p2), %s2190_s16, 63  ;;  %v2194_v3 = vld [vmem:[%s3792_s1 + $0x2] sm:$0x3] (!%p142_p2)  ;;  %vm555_vm2 = vcmask (!%p142_p2), 31744  }
   0x7   : > { %2493 = vmatpush3.bf16.msra.mxu0 (!%p142_p2), %v2968_v2  ;;  %2372 = vmatprep.subr.bf16.mxu1 (!%p142_p2), %v2930_v1  ;;  %v579_v4 = vsel (!%p142_p2), %vm577_vm0, %v2194_v3, 0  ;;  %v2250_v5 = vld [vmem:[%s3792_s1 + $0xa] sm:$0x3] (!%p142_p2)  ;;  %vm1166_vm3 = vcmask (!%p142_p2), 1045504   ;;  %vm499_vm4 = vsmask.f32 (!%p142_p2), 7424 }
   0x8   : > { %2522 = vmatprep.subr.bf16.mxu0 (!%p142_p2), %v2930_v1  ;;  %2374 = vmatprep.mubr.msk.bf16.mxu1 (!%p142_p2), %vm2931_vm1, %v2930_v1  ;;  %v1371_v11 = vsel (!%p142_p2), %vm577_vm0, %v2250_v5, 0  ;;  %v460_v27 = vld [vmem:[%s3792_s1] sm:$0x3] (!%p142_p2)  ;;  %vm1311_vm5 = vsmask.f32 (!%p142_p2), 5376  ;;  %vm1525_vm7 = vcmask (!%p142_p2), 1044480  }
   0x9   : > { %2373 = vmatpush3.bf16.msra.mxu1 (!%p142_p2), %v579_v4  ;;  %v686_v32 = vsel (!%p142_p2), %vm577_vm0, %v460_v27, 0  ;;  %vm972_vm6 = vsmask.f32 (!%p142_p2), 6400  ;;  %vm782_vm8 = vcmask (!%p142_p2), 1046528   ;;  %vm1670_vm9 = vsmask.f32 (!%p142_p2), 4352 }
   0xa   : > { %2402 = vmatprep.subr.bf16.mxu1 (!%p142_p2), %v2930_v1  ;;  %s175_s10 = smul.u32 (!%p142_p2), 13, %s2958_s13  ;;  %p181_p5 = scmp.lt.s32.totalorder (!%p142_p2), %s2958_s13, 3 }
   0xc   : > { %p176_p4 = scmp.lt.s32.totalorder (!%p142_p2), %s175_s10, 51 }
   0xd   : > { %s3828_s16 = smov (!%p170_p3, %s2190_s16), 63  ;;  %s3832_s13 = smov (!%p181_p5, %s2958_s13), 3 }
   0xe   : > { %s2191_s19 = sshll.u32 %s3828_s16, 2  ;;  %s3830_s10 = smov (!%p176_p4, %s175_s10), 51 }
   0xf   : > { %s2988_s24 = scalar_lea.vmem %s3791_s0, %s2191_s19  ;;  %s2192_s11 = sshll.u32 %s3830_s10, 3 }
  0x10   : > { %v921_v6 = vld [vmem:[%s2988_s24 + $0x4] sm:$0xe]  ;;  %v922_v7 = vld [vmem:[%s2988_s24 + $0x8] sm:$0xf]  ;;  %v2995_v9 = vld [vmem:[%s2988_s24 + $0xc] sm:$0xff]   ;;  %s3614_s16 = scalar_lea.vmem %s3793_s2, %s2192_s11  ;;  %s2193_s17 = sshll.u32 %s3832_s13, 1 }
  0x11   : > { %v2992_v8 = vcombine.low %v921_v6, %v922_v7  ;;  %v1160_v10 = vld [vmem:[%s2988_s24 + $0x4] sm:$0xc]  ;;  %v447_v13 = vld [vmem:[%s2988_s24] sm:$0xf]  ;;  %v1168_v15 = vrot.slane %v2995_v9, 2  ;;  %v3010_v17 = vld [vmem:[%s2988_s24 + $0x8] sm:$0xff]   ;;  %s184_s20 = scalar_lea.vmem %s3794_s3, %s2193_s17 }
  0x12   : > { %v2999_v12 = vcombine.low %v1160_v10, %v922_v7  ;;  %v3003_v14 = vld [vmem:[%s2988_s24 + $0x4] sm:$0xf]  ;;  %v3014_v19 = vld [vmem:[%s2988_s24 + $0x14] sm:$0xff]   ;;  %v508_v22 = vshll.u32 %v3010_v17, 16  ;;  %v512_v30 = vshrl.u32 %v3010_v17, 16  ;;  %v3038_v35 = vld [vmem:[%s2988_s24 + $0x1c] sm:$0xff]  }
  0x13   : > { %v3007_v16 = vcombine.low %v447_v13, %v3003_v14  ;;  %v3020_v23 = vld [vmem:[%s2988_s24 + $0x10] sm:$0xff]   ;;  %v1170_v28 = vrot.slane %v3014_v19, 2  ;;  %v3043_v38 = vld [vmem:[%s2988_s24 + $0x18] sm:$0xff]   ;;  %v1172_v39 = vrot.slane %v3038_v35, 2  ;;  %v3054_v43 = vld [vmem:[%s2988_s24 + $0x24] sm:$0xff]   ;;  %v982_v52 = vshrl.u32 %v2995_v9, 16 }
  0x14   : > { %v1167_v18 = vrot.slane %v2999_v12, 2  ;;  %v510_v26 = vrot.slane %v508_v22, 1  ;;  %v516_v31 = vshll.u32 %v3020_v23, 16  ;;  %v520_v41 = vshrl.u32 %v3020_v23, 16  ;;  %v934_v44 = vld [vmem:[%s2988_s24 + $0x38] sm:$0x3] }
  0x15   : > { %v501_v20 = vshrl.u32 %v3007_v16, 16  ;;  %v503_v21 = vshll.u32 %v3007_v16, 16  ;;  %v1171_v34 = vsel %vm1166_vm3, %v1168_v15, %v1170_v28  ;;  %v524_v42 = vshll.u32 %v3043_v38, 16  ;;  %v3062_v48 = vld [vmem:[%s2988_s24 + $0x20] sm:$0xff]   ;;  %v3065_v49 = vld [vmem:[%s2988_s24 + $0x34] sm:$0xf] }
  0x16   : > { %v1169_v24 = vsel %vm1166_vm3, %v1167_v18, %v1168_v15  ;;  %v514_v36 = vor.u32 %v512_v30, %v510_v26  ;;  %v518_v37 = vrot.slane %v516_v31, 1  ;;  %v1173_v45 = vsel %vm1166_vm3, %v1170_v28, %v1172_v39  ;;  %v3085_v60 = vld [vmem:[%s2988_s24] sm:$0xe]  ;;  %v3095_v5 = vld [vmem:[%s2988_s24 + $0x28] sm:$0xff]   ;;  %v461_v22 = vld [vmem:[%s2988_s24 + $0x34] sm:$0x1] }
  0x17   : > { %2495 = vmatmul.mubr.msk.bf16.vlgmr.msra.gmra.mrb[0].mxu0 %vm555_vm2, %v1169_v24  ;;  %v505_v25 = vrot.slane %v503_v21, 1  ;;  %v526_v47 = vrot.slane %v524_v42, 1  ;;  %v3068_v50 = vcombine.low %v3065_v49, %v934_v44  ;;  %v1174_v51 = vrot.slane %v3054_v43, 2  ;;  %v3111_v21 = vld [vmem:[%s2988_s24 + $0x30] sm:$0xf] }
  0x18   : > { %2523 = vmatpush3.bf16.msra.mxu0 %v1371_v11  ;;  %2498 = vmatprep.mubr.msk.bf16.mxu0 %vm2931_vm1, %v2930_v1  ;;  %v519_v40 = vsel %vm499_vm4, %v514_v36, %v518_v37  ;;  %v522_v46 = vor.u32 %v520_v41, %v518_v37  ;;  %v985_v53 = vshll.u32 %v2995_v9, 16  ;;  %v1313_v54 = vshrl.u32 %v2999_v12, 16 }
  0x19   : > { %v506_v29 = vor.u32 %v505_v25, %v501_v20  ;;  %2552 = vmatprep.subr.bf16.mxu0 %v2930_v1  ;;  %v1316_v55 = vshll.u32 %v2999_v12, 16  ;;  %v528_v57 = vshrl.u32 %v3043_v38, 16  ;;  %v532_v58 = vshll.u32 %v3062_v48, 16  ;;  %v2259_v20 = vld [vmem:[%s3792_s1 + $0xc] sm:$0x3] }
  0x1a   : > { %v527_v56 = vsel %vm499_vm4, %v522_v46, %v526_v47  ;;  %v1175_v59 = vsel %vm1166_vm3, %v1172_v39, %v1174_v51  ;;  %v1315_v61 = vrot.slane %v1313_v54, 2  ;;  %v1320_v63 = vrot.slane %v982_v52, 2 }
  0x1b   : > { %v511_v33 = vsel %vm499_vm4, %v506_v29, %v510_v26  ;;  %v1318_v62 = vrot.slane %v1316_v55, 3  ;;  %v1321_v0 = vrot.slane %v985_v53, 3  ;;  %v530_v3 = vor.u32 %v528_v57, %v526_v47 }
  0x1c   : > { %2375 = vmatmul.mubr.msk.bf16.vlgmr.msra.gmra.mrb[0].mxu1 %vm555_vm2, %v511_v33  ;;  %v534_v4 = vrot.slane %v532_v58, 1  ;;  %v2218_v6 = vcombine.low %v3085_v60, %v3003_v14  ;;  %v991_v11 = vshrl.u32 %v3014_v19, 16  ;;  %v994_v12 = vshll.u32 %v3014_v19, 16  ;;  %v1487_v14 = vld [vmem:[%s2988_s24 + $0x3c] sm:$0x7] }
  0x1d   : > { %2403 = vmatpush3.bf16.msra.mxu1 %v686_v32  ;;  %2378 = vmatprep.mubr.msk.bf16.mxu1 %vm2931_vm1, %v2930_v1  ;;  %v1319_v7 = vor.u32 %v1318_v62, %v1315_v61  ;;  %v1322_v10 = vor.u32 %v1321_v0, %v1320_v63  ;;  %v536_v15 = vshrl.u32 %v3062_v48, 16  ;;  %v540_v18 = vshll.u32 %v3095_v5, 16 }
  0x1e   : > { %2432 = vmatprep.subr.bf16.mxu1 %v2930_v1  ;;  %v535_v13 = vsel %vm499_vm4, %v530_v3, %v534_v4  ;;  %v1324_v25 = vrot.slane %v991_v11, 2  ;;  %v1325_v19 = vrot.slane %v994_v12, 3  ;;  %v1561_v26 = vsel %vm577_vm0, %v2259_v20, 0  ;;  %v3151_v3 = vld [vmem:[%s2988_s24 + $0x2c] sm:$0xff]  }
  0x1f   : > { %2499 = vmatmul.mubr.msk.bf16.gmra.mrb[4].mxu0 %vm555_vm2, %v1171_v34  ;;  %v1323_v24 = vsel %vm1311_vm5, %v1319_v7, %v1322_v10  ;;  %v538_v27 = vor.u32 %v536_v15, %v534_v4  ;;  %v542_v28 = vrot.slane %v540_v18, 1  ;;  %v3120_v29 = vcombine.low %v3111_v21, %v461_v22  ;;  %v1305_v15 = vld [vmem:[%s2988_s24 + $0x38] sm:$0x7] }
  0x20   : > { %2502 = vmatprep.mubr.msk.bf16.mxu0 %vm2931_vm1, %v2930_v1  ;;  %v1326_v30 = vor.u32 %v1325_v19, %v1324_v25  ;;  %v1000_v31 = vshrl.u32 %v3038_v35, 16  ;;  %v1003_v32 = vshll.u32 %v3038_v35, 16  ;;  %v544_v34 = vshrl.u32 %v3095_v5, 16  ;;  %v2217_v25 = vld [vmem:[%s3792_s1 + $0x4] sm:$0x3] }
  0x21   : > { %v543_v33 = vsel %vm499_vm4, %v538_v27, %v542_v28  ;;  %v548_v36 = vshll.u32 %v3120_v29, 16  ;;  %v974_v35 = vshrl.u32 %v2992_v8, 16  ;;  %v977_v44 = vshll.u32 %v2992_v8, 16 }
  0x22   : > { %v1327_v37 = vsel %vm1311_vm5, %v1322_v10, %v1326_v30  ;;  %v1328_v39 = vrot.slane %v1000_v31, 2  ;;  %v546_v41 = vor.u32 %v544_v34, %v542_v28  ;;  %v1012_v55 = vshll.u32 %v3054_v43, 16 }
  0x23   : > { %v550_v42 = vrot.slane %v548_v36, 1  ;;  %v976_v46 = vrot.slane %v974_v35, 1  ;;  %v979_v47 = vrot.slane %v977_v44, 2  ;;  %v987_v57 = vrot.slane %v985_v53, 2 }
  0x24   : > { %2379 = vmatmul.mubr.msk.bf16.gmra.mrb[4].mxu1 %vm555_vm2, %v519_v40  ;;  %v1329_v40 = vrot.slane %v1003_v32, 3  ;;  %v552_v61 = vshrl.u32 %v3120_v29, 16  ;;  %v1333_v0 = vrot.slane %v1012_v55, 3  ;;  %v993_v9 = vrot.slane %v991_v11, 1 }
  0x25   : > { %2382 = vmatprep.mubr.msk.bf16.mxu1 %vm2931_vm1, %v2930_v1  ;;  %v551_v8 = vsel %vm499_vm4, %v546_v41, %v550_v42  ;;  %v980_v58 = vor.u32 %v979_v47, %v976_v46  ;;  %v996_v53 = vrot.slane %v994_v12, 2  ;;  %v1018_v10 = vshrl.u32 %v3151_v3, 16  ;;  %v3192_v41 = vld [vmem:[%s2988_s24 + $0xc] sm:$0xf] }
  0x26   : > { %v1330_v54 = vor.u32 %v1329_v40, %v1328_v39  ;;  %v554_v4 = vor.u32 %v552_v61, %v550_v42  ;;  %v1002_v19 = vrot.slane %v1000_v31, 1  ;;  %v1014_v39 = vrot.slane %v1012_v55, 2  ;;  %v3195_v42 = vld [vmem:[%s2988_s24 + $0x10] sm:$0xf]  ;;  %v3212_v55 = vld [vmem:[%s2988_s24 + $0x14] sm:$0xf] }
  0x27   : > { %2503 = vmatmul.mubr.msk.bf16.gmra.mrb[8].mxu0 %vm555_vm2, %v1173_v45  ;;  %v1009_v45 = vshrl.u32 %v3054_v43, 16  ;;  %v997_v18 = vor.u32 %v996_v53, %v993_v9  ;;  %v1336_v11 = vrot.slane %v1018_v10, 2  ;;  %v1020_v46 = vrot.slane %v1018_v10, 1 }
  0x28   : > { %2506 = vmatprep.mubr.msk.bf16.mxu0 %vm2931_vm1, %v2930_v1  ;;  %v1331_v62 = vsel %vm1311_vm5, %v1326_v30, %v1330_v54 }
  0x29   : > { %v1332_v63 = vrot.slane %v1009_v45, 2 }
  0x2b   : > { %v1334_v7 = vor.u32 %v1333_v0, %v1332_v63  ;;  %v1030_v63 = vshll.u32 %v3068_v50, 16 }
  0x2c   : > { %2383 = vmatmul.mubr.msk.bf16.gmra.mrb[8].mxu1 %vm555_vm2, %v527_v56  ;;  %v984_v56 = vrot.slane %v982_v52, 1 }
  0x2d   : > { %2386 = vmatprep.mubr.msk.bf16.mxu1 %vm2931_vm1, %v2930_v1  ;;  %v1335_v22 = vsel %vm1311_vm5, %v1330_v54, %v1334_v7  ;;  %v1474_v54 = vld [vmem:[%s2988_s24 + $0x8] sm:$0x8]  ;;  %v1032_v9 = vrot.slane %v1030_v63, 2 }
  0x2f   : > { %2507 = vmatmul.mubr.msk.bf16.gmra.mrb[12].mxu0 %vm555_vm2, %v1175_v59  ;;  %v988_v59 = vor.u32 %v987_v57, %v984_v56  ;;  %v3215_v57 = vld [vmem:[%s2988_s24 + $0x18] sm:$0xf] }
  0x30   : > { %2524 = vmatprep.mubr.msk.bf16.mxu0 %vm2931_vm1, %v2930_v1  ;;  %v2285_v61 = vcombine.low %v3212_v55, %v3215_v57 }
  0x31   : > { %v3154_v52 = vsel %vm972_vm6, %v980_v58, %v988_v59  ;;  %v3165_v20 = vsel %vm972_vm6, %v988_v59, %v997_v18  ;;  %v3223_v58 = vcombine.low %v1474_v54, %v3192_v41  ;;  %v3227_v59 = vcombine.low %v3195_v42, %v3212_v55  ;;  %v3334_v54 = vld [vmem:[%s2988_s24 + $0x38] sm:$0xf] }
  0x33   : > { %v1526_v53 = vrot.slane %v3223_v58, 3 }
  0x34   : > { %2387 = vmatmul.mubr.msk.bf16.gmra.mrb[12].mxu1 %vm555_vm2, %v535_v13  ;;  %v1021_v13 = vshll.u32 %v3151_v3, 16 }
  0x35   : > { %2390 = vmatprep.mubr.msk.bf16.mxu1 %vm2931_vm1, %v2930_v1 }
  0x36   : > { %v1337_v12 = vrot.slane %v1021_v13, 3  ;;  %v1023_v47 = vrot.slane %v1021_v13, 2  ;;  %v2274_v13 = vld [vmem:[%s3792_s1 + $0xe] sm:$0x3] }
  0x37   : > { %2525 = vmatmul.mubr.msk.bf16.vlgmr.msra.gmra.mrb[0].mxu0 %vm555_vm2, %v1323_v24  ;;  %v2251_v24 = vcombine.low %v3065_v49, %v1305_v15  ;;  %v818_v49 = vsel %vm577_vm0, %v2217_v25, 0  ;;  %v3270_v25 = vld [vmem:[%s2988_s24 + $0x24] sm:$0xf] }
  0x38   : > { %2553 = vmatpush3.bf16.msra.mxu0 %v1561_v26  ;;  %2528 = vmatprep.mubr.msk.bf16.mxu0 %vm2931_vm1, %v2930_v1  ;;  %v1005_v26 = vrot.slane %v1003_v32, 2  ;;  %v1338_v27 = vor.u32 %v1337_v12, %v1336_v11  ;;  %v1024_v56 = vor.u32 %v1023_v47, %v1020_v46  ;;  %v1755_v11 = vsel %vm577_vm0, %v2274_v13, 0 }
  0x39   : > { %2582 = vmatprep.subr.bf16.mxu0 %v2930_v1  ;;  %v1341_v28 = vshrl.u32 %v2251_v24, 16  ;;  %v1344_v30 = vshll.u32 %v2251_v24, 16  ;;  %v3267_v24 = vld [vmem:[%s2988_s24 + $0x20] sm:$0xf]  ;;  %v1683_v13 = vshll.u32 %v3227_v59, 16 }
  0x3a   : > { %v1339_v31 = vsel %vm1311_vm5, %v1334_v7, %v1338_v27  ;;  %v3241_v7 = vld [vmem:[%s2988_s24 + $0x1c] sm:$0xf] }
  0x3b   : > { %v1343_v32 = vrot.slane %v1341_v28, 2  ;;  %v1346_v36 = vrot.slane %v1344_v30, 3  ;;  %v3287_v28 = vld [vmem:[%s2988_s24 + $0x28] sm:$0xf]  ;;  %v3290_v30 = vld [vmem:[%s2988_s24 + $0x2c] sm:$0xf] }
  0x3c   : > { %2391 = vmatmul.mubr.msk.bf16.gmra.mrb[16].mxu1 %vm555_vm2, %v543_v33  ;;  %v1006_v33 = vor.u32 %v1005_v26, %v1002_v19  ;;  %v3278_v26 = vcombine.low %v3267_v24, %v3270_v25 }
  0x3d   : > { %2394 = vmatprep.mubr.msk.bf16.mxu1 %vm2931_vm1, %v2930_v1 }
  0x3e   : > { %v3180_v34 = vsel %vm972_vm6, %v997_v18, %v1006_v33 }
  0x3f   : > { %2529 = vmatmul.mubr.msk.bf16.gmra.mrb[4].mxu0 %vm555_vm2, %v1327_v37  ;;  %v1011_v37 = vrot.slane %v1009_v45, 1  ;;  %v2284_v45 = vcombine.low %v3192_v41, %v3195_v42 }
  0x40   : > { %2532 = vmatprep.mubr.msk.bf16.mxu0 %vm2931_vm1, %v2930_v1 }
  0x41   : > { %v1015_v40 = vor.u32 %v1014_v39, %v1011_v37  ;;  %v3311_v37 = vld [vmem:[%s2988_s24 + $0x34] sm:$0xf] }
  0x42   : > { %v2289_v43 = vcombine.low %v3311_v37, %v3334_v54 }
  0x43   : > { %v3198_v35 = vsel %vm972_vm6, %v1006_v33, %v1015_v40 }
  0x44   : > { %2395 = vmatmul.mubr.msk.bf16.gmra.mrb[20].mxu1 %vm555_vm2, %v551_v8  ;;  %v3218_v8 = vsel %vm972_vm6, %v1015_v40, %v1024_v56  ;;  %v784_v40 = vrot.slane %v3010_v17, 1 }
  0x45   : > { %2398 = vmatprep.mubr.msk.bf16.mxu1 %vm2931_vm1, %v2930_v1 }
  0x47   : > { %2533 = vmatmul.mubr.msk.bf16.gmra.mrb[8].mxu0 %vm555_vm2, %v1331_v62  ;;  %v1027_v62 = vshrl.u32 %v3068_v50, 16 }
  0x48   : > { %2536 = vmatprep.mubr.msk.bf16.mxu0 %vm2931_vm1, %v2930_v1 }
  0x49   : > { %v1029_v0 = vrot.slane %v1027_v62, 1 }
  0x4b   : > { %v3243_v10 = vor.u32 %v1032_v9, %v1029_v0  ;;  %v788_v9 = vrot.slane %v3043_v38, 1 }
  0x4c   : > { %2399 = vmatmul.mubr.msk.bf16.gmra.mrb[24].mxu1 %vm555_vm2, %v554_v4  ;;  %v1527_v4 = vrot.slane %v3227_v59, 3 }
  0x4d   : > { %2404 = vmatprep.mubr.msk.bf16.mxu1 %vm2931_vm1, %v2930_v1  ;;  %v3250_v15 = vsel %vm972_vm6, %v1024_v56, %v3243_v10  ;;  %v786_v56 = vrot.slane %v3020_v23, 1 }
  0x4e   : > { %v1528_v18 = vsel %vm1525_vm7, %v1526_v53, %v1527_v4  ;;  %v1675_v53 = vshll.u32 %v3223_v58, 16 }
  0x4f   : > { %2537 = vmatmul.mubr.msk.bf16.gmra.mrb[12].mxu0 %vm555_vm2, %v1335_v22  ;;  %v3257_v22 = vcombine.low %v3215_v57, %v3241_v7  ;;  %v787_v63 = vsel %vm782_vm8, %v784_v40, %v786_v56 }
  0x50   : > { %2540 = vmatprep.mubr.msk.bf16.mxu0 %vm2931_vm1, %v2930_v1 }
  0x51   : > { %v1529_v12 = vrot.slane %v3257_v22, 3 }
  0x53   : > { %v1530_v19 = vsel %vm1525_vm7, %v1527_v4, %v1529_v12  ;;  %v1680_v4 = vshrl.u32 %v3227_v59, 16 }
  0x54   : > { %2405 = vmatmul.mubr.msk.bf16.vlgmr.msra.gmra.mrb[0].mxu1 %vm555_vm2, %v3007_v16  ;;  %v1347_v16 = vor.u32 %v1346_v36, %v1343_v32  ;;  %v3308_v36 = vld [vmem:[%s2988_s24 + $0x30] sm:$0xf] }
  0x55   : > { %2433 = vmatpush3.bf16.msra.mxu1 %v818_v49  ;;  %2408 = vmatprep.mubr.msk.bf16.mxu1 %vm2931_vm1, %v2930_v1  ;;  %v3297_v49 = vcombine.low %v3287_v28, %v3290_v30  ;;  %v2288_v42 = vcombine.low %v3290_v30, %v3308_v36 }
  0x56   : > { %2462 = vmatprep.subr.bf16.mxu1 %v2930_v1  ;;  %v1348_v44 = vsel %vm1311_vm5, %v1338_v27, %v1347_v16  ;;  %v1531_v27 = vrot.slane %v3278_v26, 3 }
  0x57   : > { %2541 = vmatmul.mubr.msk.bf16.gmra.mrb[16].mxu0 %vm555_vm2, %v1339_v31  ;;  %v2209_v31 = vcombine.low %v3111_v21, %v3111_v21  ;;  %v1533_v32 = vrot.slane %v3297_v49, 3  ;;  %v783_v21 = vrot.slane %v2218_v6, 1  ;;  %v2266_v6 = vcombine.low %v3334_v54, %v1487_v14 }
  0x58   : > { %2544 = vmatprep.mubr.msk.bf16.mxu0 %vm2931_vm1, %v2930_v1  ;;  %v1532_v33 = vsel %vm1525_vm7, %v1529_v12, %v1531_v27  ;;  %v1677_v12 = vrot.slane %v1675_v53, 4  ;;  %v1701_v14 = vshll.u32 %v3278_v26, 16 }
  0x59   : > { %v1534_v39 = vsel %vm1525_vm7, %v1531_v27, %v1533_v32  ;;  %v785_v47 = vsel %vm782_vm8, %v783_v21, %v784_v40  ;;  %v1537_v62 = vrot.slane %v2266_v6, 3  ;;  %v790_v27 = vrot.slane %v3062_v48, 1 }
  0x5c   : > { %2409 = vmatmul.mubr.msk.bf16.gmra.mrb[4].mxu1 %vm555_vm2, %v3010_v17 }
  0x5d   : > { %2412 = vmatprep.mubr.msk.bf16.mxu1 %vm2931_vm1, %v2930_v1 }
  0x5f   : > { %2545 = vmatmul.mubr.msk.bf16.gmra.mrb[20].mxu0 %vm555_vm2, %v1348_v44  ;;  %v2226_v44 = vld [vmem:[%s3792_s1 + $0x6] sm:$0x3] }
  0x60   : > { %2548 = vmatprep.mubr.msk.bf16.mxu0 %vm2931_vm1, %v2930_v1  ;;  %v1057_v60 = vsel %vm577_vm0, %v2226_v44, 0 }
  0x64   : > { %2413 = vmatmul.mubr.msk.bf16.gmra.mrb[8].mxu1 %vm555_vm2, %v3020_v23  ;;  %v1672_v23 = vshrl.u32 %v3223_v58, 16 }
  0x65   : > { %2416 = vmatprep.mubr.msk.bf16.mxu1 %vm2931_vm1, %v2930_v1 }
  0x67   : > { %2549 = vmatmul.mubr.msk.bf16.gmra.mrb[24].mxu0 %vm555_vm2, %v1347_v16  ;;  %v3317_v16 = vcombine.low %v3308_v36, %v3311_v37 }
  0x68   : > { %2554 = vmatprep.mubr.msk.bf16.mxu0 %vm2931_vm1, %v2930_v1 }
  0x69   : > { %v1535_v46 = vrot.slane %v3317_v16, 3 }
  0x6b   : > { %v1536_v17 = vsel %vm1525_vm7, %v1533_v32, %v1535_v46  ;;  %v1538_v0 = vsel %vm1525_vm7, %v1535_v46, %v1537_v62  ;;  %v791_v32 = vsel %vm782_vm8, %v788_v9, %v790_v27 }
  0x6c   : > { %2417 = vmatmul.mubr.msk.bf16.gmra.mrb[12].mxu1 %vm555_vm2, %v3043_v38  ;;  %v1682_v38 = vrot.slane %v1680_v4, 3  ;;  %v1716_v4 = vshrl.u32 %v3317_v16, 16 }
  0x6d   : > { %2420 = vmatprep.mubr.msk.bf16.mxu1 %vm2931_vm1, %v2930_v1 }
  0x6f   : > { %2555 = vmatmul.mubr.msk.bf16.vlgmr.msra.gmra.mrb[0].mxu0 %vm555_vm2, %v1528_v18  ;;  %v789_v18 = vsel %vm782_vm8, %v786_v56, %v788_v9  ;;  %v1703_v56 = vrot.slane %v1701_v14, 4 }
  0x70   : > { %2583 = vmatpush3.bf16.msra.mxu0 %v1755_v11  ;;  %2558 = vmatprep.mubr.msk.bf16.mxu0 %vm2931_vm1, %v2930_v1  ;;  %v1674_v11 = vrot.slane %v1672_v23, 3 }
  0x71   : > { %2612 = vmatprep.subr.bf16.mxu0 %v2930_v1 }
  0x72   : > { %v1678_v58 = vor.u32 %v1677_v12, %v1674_v11  ;;  %v1718_v11 = vrot.slane %v1716_v4, 3 }
  0x74   : > { %2421 = vmatmul.mubr.msk.bf16.gmra.mrb[16].mxu1 %vm555_vm2, %v3062_v48 }
  0x75   : > { %2424 = vmatprep.mubr.msk.bf16.mxu1 %vm2931_vm1, %v2930_v1 }
  0x77   : > { %2559 = vmatmul.mubr.msk.bf16.gmra.mrb[4].mxu0 %vm555_vm2, %v1530_v19  ;;  %v1685_v19 = vrot.slane %v1683_v13, 4  ;;  %v3408_v13 = vld [vmem:[%s2988_s24 + $0x3c] sm:$0xf] }
  0x78   : > { %2562 = vmatprep.mubr.msk.bf16.mxu0 %vm2931_vm1, %v2930_v1 }
  0x79   : > { %v1686_v59 = vor.u32 %v1685_v19, %v1682_v38  ;;  %v2275_v38 = vcombine.low %v3334_v54, %v3408_v13 }
  0x7b   : > { %v1687_v48 = vsel %vm1670_vm9, %v1678_v58, %v1686_v59  ;;  %v1725_v19 = vshrl.u32 %v2275_v38, 16 }
  0x7c   : > { %2425 = vmatmul.mubr.msk.bf16.gmra.mrb[20].mxu1 %vm555_vm2, %v3095_v5 }
  0x7d   : > { %2428 = vmatprep.mubr.msk.bf16.mxu1 %vm2931_vm1, %v2930_v1 }
  0x7f   : > { %2563 = vmatmul.mubr.msk.bf16.gmra.mrb[8].mxu0 %vm555_vm2, %v1532_v33  ;;  %v1689_v33 = vshrl.u32 %v3257_v22, 16 }
  0x80   : > { %2566 = vmatprep.mubr.msk.bf16.mxu0 %vm2931_vm1, %v2930_v1 }
  0x81   : > { %v1691_v21 = vrot.slane %v1689_v33, 3 }
  0x84   : > { %2429 = vmatmul.mubr.msk.bf16.gmra.mrb[24].mxu1 %vm555_vm2, %v2209_v31  ;;  %v1692_v31 = vshll.u32 %v3257_v22, 16  ;;  %v792_v22 = vrot.slane %v3095_v5, 1  ;;  %v794_v5 = vrot.slane %v3120_v29, 1 }
  0x85   : > { %2434 = vmatprep.mubr.msk.bf16.mxu1 %vm2931_vm1, %v2930_v1 }
  0x86   : > { %v1694_v40 = vrot.slane %v1692_v31, 4 }
  0x87   : > { %2567 = vmatmul.mubr.msk.bf16.gmra.mrb[12].mxu0 %vm555_vm2, %v1534_v39  ;;  %v2283_v39 = vld [vmem:[%s3792_s1 + $0x10] sm:$0x3] }
  0x88   : > { %2570 = vmatprep.mubr.msk.bf16.mxu0 %vm2931_vm1, %v2930_v1  ;;  %v1889_v44 = vsel %vm577_vm0, %v2283_v39, 0  ;;  %v1695_v46 = vor.u32 %v1694_v40, %v1691_v21 }
  0x8c   : > { %2435 = vmatmul.mubr.msk.bf16.vlgmr.msra.gmra.mrb[0].mxu1 %vm555_vm2, %v785_v47  ;;  %v1698_v47 = vshrl.u32 %v3278_v26, 16 }
  0x8d   : > { %2463 = vmatpush3.bf16.msra.mxu1 %v1057_v60  ;;  %2438 = vmatprep.mubr.msk.bf16.mxu1 %vm2931_vm1, %v2930_v1  ;;  %v793_v60 = vsel %vm782_vm8, %v790_v27, %v792_v22  ;;  %v1728_v27 = vshll.u32 %v2275_v38, 16 }
  0x8e   : > { %2642 = vmatprep.subr.bf16.mxu1 %v2930_v1  ;;  %v1700_v6 = vrot.slane %v1698_v47, 3 }
  0x8f   : > { %2571 = vmatmul.mubr.msk.bf16.gmra.mrb[16].mxu0 %vm555_vm2, %v1536_v17  ;;  %v1696_v17 = vsel %vm1670_vm9, %v1686_v59, %v1695_v46  ;;  %v1727_v59 = vrot.slane %v1725_v19, 3  ;;  %v1730_v33 = vrot.slane %v1728_v27, 4 }
  0x90   : > { %2574 = vmatprep.mubr.msk.bf16.mxu0 %vm2931_vm1, %v2930_v1  ;;  %v1704_v26 = vor.u32 %v1703_v56, %v1700_v6 }
  0x91   : > { %v1731_v31 = vor.u32 %v1730_v33, %v1727_v59 }
  0x92   : > { %v1705_v9 = vsel %vm1670_vm9, %v1695_v46, %v1704_v26 }
  0x94   : > { %2439 = vmatmul.mubr.msk.bf16.gmra.mrb[4].mxu1 %vm555_vm2, %v787_v63  ;;  %v1710_v63 = vshll.u32 %v3297_v49, 16 }
  0x95   : > { %2442 = vmatprep.mubr.msk.bf16.mxu1 %vm2931_vm1, %v2930_v1 }
  0x96   : > { %v1712_v53 = vrot.slane %v1710_v63, 4 }
  0x97   : > { %2575 = vmatmul.mubr.msk.bf16.gmra.mrb[20].mxu0 %vm555_vm2, %v1538_v0  ;;  %v795_v0 = vsel %vm782_vm8, %v792_v22, %v794_v5 }
  0x98   : > { %2578 = vmatprep.mubr.msk.bf16.mxu0 %vm2931_vm1, %v2930_v1 }
  0x9c   : > { %2443 = vmatmul.mubr.msk.bf16.gmra.mrb[8].mxu1 %vm555_vm2, %v789_v18 }
  0x9d   : > { %2446 = vmatprep.mubr.msk.bf16.mxu1 %vm2931_vm1, %v2930_v1 }
  0x9f   : > { %2579 = vmatmul.mubr.msk.bf16.gmra.mrb[24].mxu0 %vm555_vm2, %v1537_v62  ;;  %v1707_v62 = vshrl.u32 %v3297_v49, 16  ;;  %v1719_v49 = vshll.u32 %v3317_v16, 16 }
  0xa0   : > { %2584 = vmatprep.mubr.msk.bf16.mxu0 %vm2931_vm1, %v2930_v1 }
  0xa1   : > { %v1709_v23 = vrot.slane %v1707_v62, 3  ;;  %v1721_v12 = vrot.slane %v1719_v49, 4 }
  0xa3   : > { %v1713_v29 = vor.u32 %v1712_v53, %v1709_v23  ;;  %v1722_v16 = vor.u32 %v1721_v12, %v1718_v11 }
  0xa4   : > { %2447 = vmatmul.mubr.msk.bf16.gmra.mrb[12].mxu1 %vm555_vm2, %v791_v32 }
  0xa5   : > { %2450 = vmatprep.mubr.msk.bf16.mxu1 %vm2931_vm1, %v2930_v1  ;;  %v1714_v18 = vsel %vm1670_vm9, %v1704_v26, %v1713_v29  ;;  %v1723_v58 = vsel %vm1670_vm9, %v1713_v29, %v1722_v16 }
  0xa7   : > { %2585 = vmatmul.mubr.msk.bf16.vlgmr.msra.gmra.mrb[0].mxu0 %vm555_vm2, %v1687_v48 }
  0xa8   : > { %2613 = vmatpush3.bf16.msra.mxu0 %v1889_v44  ;;  %2588 = vmatprep.mubr.msk.bf16.mxu0 %vm2931_vm1, %v2930_v1 }
  0xac   : > { %2451 = vmatmul.mubr.msk.bf16.gmra.mrb[16].mxu1 %vm555_vm2, %v793_v60 }
  0xad   : > { %2454 = vmatprep.mubr.msk.bf16.mxu1 %vm2931_vm1, %v2930_v1 }
  0xaf   : > { %2589 = vmatmul.mubr.msk.bf16.gmra.mrb[4].mxu0 %vm555_vm2, %v1696_v17 }
  0xb0   : > { %2592 = vmatprep.mubr.msk.bf16.mxu0 %vm2931_vm1, %v2930_v1 }
  0xb4   : > { %2455 = vmatmul.mubr.msk.bf16.gmra.mrb[20].mxu1 %vm555_vm2, %v795_v0 }
  0xb5   : > { %2458 = vmatprep.mubr.msk.bf16.mxu1 %vm2931_vm1, %v2930_v1 }
  0xb7   : > { %2593 = vmatmul.mubr.msk.bf16.gmra.mrb[8].mxu0 %vm555_vm2, %v1705_v9 }
  0xb8   : > { %2596 = vmatprep.mubr.msk.bf16.mxu0 %vm2931_vm1, %v2930_v1 }
  0xbc   : > { %2459 = vmatmul.mubr.msk.bf16.gmra.mrb[24].mxu1 %vm555_vm2, %v794_v5 }
  0xbd   : > { %2464 = vmatprep.mubr.msk.bf16.mxu1 %vm2931_vm1, %v2930_v1 }
  0xbf   : > { %2597 = vmatmul.mubr.msk.bf16.gmra.mrb[12].mxu0 %vm555_vm2, %v1714_v18 }
  0xc0   : > { %2600 = vmatprep.mubr.msk.bf16.mxu0 %vm2931_vm1, %v2930_v1 }
  0xc4   : > { %2465 = vmatmul.mubr.msk.bf16.vlgmr.msra.gmra.mrb[0].mxu1 %vm555_vm2, %v3154_v52  ;;  %v1732_v52 = vsel %vm1670_vm9, %v1722_v16, %v1731_v31 }
  0xc5   : > { %2643 = vmatpush3.bf16.msra.mxu1 %v2968_v2  ;;  %2468 = vmatprep.mubr.msk.bf16.mxu1 %vm2931_vm1, %v2930_v1  ;;  %v2286_v2 = vcombine.low %v3241_v7, %v3267_v24 }
  0xc7   : > { %2601 = vmatmul.mubr.msk.bf16.gmra.mrb[16].mxu0 %vm555_vm2, %v1723_v58 }
  0xc8   : > { %2604 = vmatprep.mubr.msk.bf16.mxu0 %vm2931_vm1, %v2930_v1 }
  0xcc   : > { %2469 = vmatmul.mubr.msk.bf16.gmra.mrb[4].mxu1 %vm555_vm2, %v3165_v20  ;;  %v2287_v20 = vcombine.low %v3270_v25, %v3287_v28 }
  0xcd   : > { %2472 = vmatprep.mubr.msk.bf16.mxu1 %vm2931_vm1, %v2930_v1 }
  0xcf   : > { %2605 = vmatmul.mubr.msk.bf16.gmra.mrb[20].mxu0 %vm555_vm2, %v1732_v52 }
  0xd0   : > { %2608 = vmatprep.mubr.msk.bf16.mxu0 %vm2931_vm1, %v2930_v1 }
  0xd4   : > { %2473 = vmatmul.mubr.msk.bf16.gmra.mrb[8].mxu1 %vm555_vm2, %v3180_v34  ;;  %v1176_v34 = vrot.slane %v3151_v3, 2 }
  0xd5   : > { %2476 = vmatprep.mubr.msk.bf16.mxu1 %vm2931_vm1, %v2930_v1 }
  0xd6   : > { %v1177_v41 = vsel %vm1166_vm3, %v1174_v51, %v1176_v34  ;;  %v186_v51 = vlaneseq }
  0xd7   : > { %2609 = vmatmul.mubr.msk.bf16.gmra.mrb[24].mxu0 %vm555_vm2, %v1731_v31 }
  0xd8   : > { %2614 = vmatprep.mubr.msk.bf16.mxu0 %vm2931_vm1, %v2930_v1 }
  0xdc   : > { %2477 = vmatmul.mubr.msk.bf16.gmra.mrb[12].mxu1 %vm555_vm2, %v3198_v35  ;;  %v1178_v35 = vrot.slane %v3068_v50, 2  ;;  %v2290_v50 = vcombine.low %v3408_v13, %v3408_v13 }
  0xdd   : > { %2480 = vmatprep.mubr.msk.bf16.mxu1 %vm2931_vm1, %v2930_v1 }
  0xde   : > { %v1179_v3 = vsel %vm1166_vm3, %v1176_v34, %v1178_v35 }
  0xdf   : > { %2615 = vmatmul.mubr.msk.bf16.vlgmr.msra.gmra.mrb[0].mxu0 %vm555_vm2, %v2284_v45  ;;  %v3507_v45 = vshrl.u32 %v186_v51, 7 }
  0xe0   : > { %2618 = vmatprep.mubr.msk.bf16.mxu0 %vm2931_vm1, %v2930_v1 }
  0xe1   : > { %v188_v55 = vadd.s32 8, %v3507_v45  ;;  %v3531_v39 = vadd.s32 32, %v3507_v45  ;;  %v3546_v56 = vadd.s32 40, %v3507_v45  ;;  %v3556_v29 = vadd.s32 48, %v3507_v45 }
  0xe2   : > { %v3564_v11 = vadd.s32 56, %v3507_v45 }
  0xe3   : > { %v3540_v14 = vmul.u32.u64.low 3123612579, %v3531_v39  ;;  %v3541_v60 = vmul.u32.u64.high 3123612579, %v3531_v39, %v3540_v14  ;;  %v3552_v9 = vmul.u32.u64.low 3123612579, %v3546_v56  ;;  %v3553_v23 = vmul.u32.u64.high 3123612579, %v3546_v56, %v3552_v9 }
  0xe4   : > { %2481 = vmatmul.mubr.msk.bf16.gmra.mrb[16].mxu1 %vm555_vm2, %v3218_v8  ;;  %v3511_v57 = vmul.u32.u64.low 3123612579, %v3507_v45  ;;  %v3512_v8 = vmul.u32.u64.high 3123612579, %v3507_v45, %v3511_v57  ;;  %v3575_v19 = vmul.u32.u64.low 3123612579, %v3556_v29  ;;  %v3576_v27 = vmul.u32.u64.high 3123612579, %v3556_v29, %v3575_v19 }
  0xe5   : > { %2484 = vmatprep.mubr.msk.bf16.mxu1 %vm2931_vm1, %v2930_v1  ;;  %v263_v18 = vshrl.u32 %v3541_v60, 3  ;;  %v3585_v31 = vmul.u32.u64.low 3123612579, %v3564_v11  ;;  %v3586_v52 = vmul.u32.u64.high 3123612579, %v3564_v11, %v3585_v31  ;;  %v274_v34 = vshrl.u32 %v3553_v23, 3 }
  0xe6   : > { %v219_v32 = vshrl.u32 %v3512_v8, 3 }
  0xe7   : > { %2619 = vmatmul.mubr.msk.bf16.gmra.mrb[4].mxu0 %vm555_vm2, %v2285_v61  ;;  %v189_v61 = vadd.s32 16, %v3507_v45  ;;  %v264_v33 = vmul.u32 11, %v263_v18  ;;  %v3669_v18 = vadd.s32 88, %v3507_v45 }
  0xe8   : > { %2622 = vmatprep.mubr.msk.bf16.mxu0 %vm2931_vm1, %v2930_v1  ;;  %v220_v22 = vmul.u32 11, %v219_v32 }
  0xe9   : > { %v3523_v28 = vmul.u32.u64.low 3123612579, %v189_v61  ;;  %v3524_v30 = vmul.u32.u64.high 3123612579, %v189_v61, %v3523_v28 }
  0xea   : > { %v221_v5 = vsub.s32 %v3507_v45, %v220_v22  ;;  %v296_v22 = vshrl.u32 %v3586_v52, 3 }
  0xeb   : > { %v241_v46 = vshrl.u32 %v3524_v30, 3  ;;  %v285_v30 = vshrl.u32 %v3576_v27, 3 }
  0xec   : > { %2485 = vmatmul.mubr.msk.bf16.gmra.mrb[20].mxu1 %vm555_vm2, %v3250_v15  ;;  %v190_v15 = vadd.s32 24, %v3507_v45  ;;  %vm356_vm10 = vcmp.ne.s32.totalorder %v221_v5, 0  ;;  %vm369_vm11 = vcmp.lt.s32.totalorder %v221_v5, 0  ;;  %v395_v12 = vadd.s32 11, %v221_v5 }
  0xed   : > { %2488 = vmatprep.mubr.msk.bf16.mxu1 %vm2931_vm1, %v2930_v1  ;;  %v242_v26 = vmul.u32 11, %v241_v46  ;;  %vm3570_vm14 = vmand %vm369_vm11, %vm356_vm10 }
  0xee   : > { %v3526_v37 = vmul.u32.u64.low 3123612579, %v190_v15  ;;  %v3527_v54 = vmul.u32.u64.high 3123612579, %v190_v15, %v3526_v37 }
  0xef   : > { %2623 = vmatmul.mubr.msk.bf16.gmra.mrb[8].mxu0 %vm555_vm2, %v2286_v2  ;;  %v3560_v49 = vsub.s32 %v189_v61, %v242_v26  ;;  %v3623_v61 = vsub.s32 %v3531_v39, %v264_v33 }
  0xf0   : > { %2626 = vmatprep.mubr.msk.bf16.mxu0 %vm2931_vm1, %v2930_v1  ;;  %v252_v6 = vshrl.u32 %v3527_v54, 3 }
  0xf1   : > { %vm358_vm15 = vcmp.ne.s32.totalorder %v3560_v49, 0  ;;  %vm360_vm8 = vcmp.ne.s32.totalorder %v3623_v61, 0  ;;  %vm373_vm9 = vcmp.lt.s32.totalorder %v3623_v61, 0 }
  0xf2   : > { %v253_v0 = vmul.u32 11, %v252_v6  ;;  %vm3652_vm10 = vmand %vm373_vm9, %vm360_vm8 }
  0xf4   : > { %2489 = vmatmul.mubr.msk.bf16.gmra.mrb[24].mxu1 %vm555_vm2, %v3243_v10  ;;  %v3568_v38 = vsub.s32 %v190_v15, %v253_v0  ;;  %v275_v15 = vmul.u32 11, %v274_v34 }
  0xf5   : > { %2510 = vmatprep.mubr.msk.bf16.mxu1 %vm2931_vm1, %v2930_v1 }
  0xf6   : > { %vm372_vm3 = vcmp.lt.s32.totalorder %v3568_v38, 0  ;;  %v398_v51 = vadd.s32 11, %v3568_v38 }
  0xf7   : > { %2627 = vmatmul.mubr.msk.bf16.gmra.mrb[12].mxu0 %vm555_vm2, %v2287_v20  ;;  %v408_v20 = vsel %vm3570_vm14, %v395_v12, %v221_v5  ;;  %v286_v5 = vmul.u32 11, %v285_v30 }
  0xf8   : > { %2630 = vmatprep.mubr.msk.bf16.mxu0 %vm2931_vm1, %v2930_v1  ;;  %vm421_vm5 = vcmp.lt.s32.totalorder %v408_v20, 9 }
  0xf9   : > { %v287_v19 = vsub.s32 %v3556_v29, %v286_v5 }
  0xfc   : > { %2511 = vmatmul.mubr.msk.bf16.vlgmr.msra.gmra.mrb[16].mxu1 %vm555_vm2, %v1177_v41 }
  0xfd   : > { %2514 = vmatprep.mubr.msk.bf16.mxu1 %vm2931_vm1, %v2930_v1 }
  0xff   : > { %2631 = vmatmul.mubr.msk.bf16.gmra.mrb[16].mxu0 %vm555_vm2, %v2288_v42  ;;  %v3597_v42 = vadd.s32 64, %v3507_v45 }
 0x100   : > { %2634 = vmatprep.mubr.msk.bf16.mxu0 %vm2931_vm1, %v2930_v1 }
 0x104   : > { %2515 = vmatmul.mubr.msk.bf16.gmra.mrb[20].mxu1 %vm555_vm2, %v1179_v3 }
 0x105   : > { %2518 = vmatprep.mubr.msk.bf16.mxu1 %vm2931_vm1, %v2930_v1 }
 0x107   : > { %2635 = vmatmul.mubr.msk.bf16.gmra.mrb[20].mxu0 %vm555_vm2, %v2289_v43 }
 0x108   : > { %2638 = vmatprep.mubr.msk.bf16.mxu0 %vm2931_vm1, %v2930_v1  ;;  %v3517_v1 = vmul.u32.u64.low 3123612579, %v188_v55  ;;  %v3518_v10 = vmul.u32.u64.high 3123612579, %v188_v55, %v3517_v1  ;;  %vm371_vm1 = vcmp.lt.s32.totalorder %v3560_v49, 0 }
 0x109   : > { %vm3605_vm4 = vmand %vm371_vm1, %vm358_vm15  ;;  %vm362_vm1 = vcmp.ne.s32.totalorder %v287_v19, 0 }
 0x10a   : > { %v230_v21 = vshrl.u32 %v3518_v10, 3 }
 0x10c   : > { %2519 = vmatmul.mubr.msk.bf16.gmra.mrb[24].mxu1 %vm555_vm2, %v1178_v35  ;;  %v231_v17 = vmul.u32 11, %v230_v21 }
 0x10e   : > { %v232_v63 = vsub.s32 %v188_v55, %v231_v17 }
 0x10f   : > { %2639 = vmatmul.mubr.msk.bf16.gmra.mrb[24].mxu0 %vm555_vm2, %v2290_v50  ;;  %vm359_vm2 = vcmp.ne.s32.totalorder %v3568_v38, 0  ;;  %v397_v50 = vadd.s32 11, %v3560_v49 }
 0x110   : > { %vm357_vm12 = vcmp.ne.s32.totalorder %v232_v63, 0  ;;  %vm370_vm13 = vcmp.lt.s32.totalorder %v232_v63, 0  ;;  %v396_v58 = vadd.s32 11, %v232_v63  ;;  %vm3618_vm6 = vmand %vm372_vm3, %vm359_vm2  ;;  %vm375_vm2 = vcmp.lt.s32.totalorder %v287_v19, 0 }
 0x111   : > { %vm3579_vm0 = vmand %vm370_vm13, %vm357_vm12  ;;  %v411_v21 = vsel %vm3618_vm6, %v398_v51, %v3568_v38 }
 0x112   : > { %v409_v3 = vsel %vm3579_vm0, %v396_v58, %v232_v63  ;;  %v3657_v63 = vadd.s32 80, %v3507_v45  ;;  %vm3663_vm12 = vcmp.lt.s32.totalorder %v411_v21, 9  ;;  %vm3715_vm6 = vmand %vm375_vm2, %vm362_vm1 }
 0x113   : > { %vm422_vm7 = vcmp.lt.s32.totalorder %v409_v3, 9 }
 0x114   : > { %v3681_v33 = vmul.u32.u64.low 3123612579, %v3657_v63  ;;  %v3682_v31 = vmul.u32.u64.high 3123612579, %v3657_v63, %v3681_v33 }
 0x197   : > { %v3515_v7 = vpop.f32.mrb[0].mxu1 }
 0x198   : > { %v2466_v24 = vpop.f32.mrb[1].mxu1 }
 0x199   : > { %v3521_v25 = vpop.f32.mrb[2].mxu1  ;;  %v3627_v24 = vadd.s32 72, %v3507_v45 }
 0x19a   : > { %v2467_v36 = vpop.f32.mrb[3].mxu1 }
 0x19b   : > { %v3631_v36 = vmul.u32.u64.low 3123612579, %v3597_v42  ;;  %v3632_v37 = vmul.u32.u64.high 3123612579, %v3597_v42, %v3631_v36 }
 0x19d   : > { %v307_v27 = vshrl.u32 %v3632_v37, 3 }
 0x19f   : > { %v3533_v48 = vpop.f32.mrb[4].mxu1 }
 0x1a0   : > { %v2470_v40 = vpop.f32.mrb[5].mxu1 }
 0x1a1   : > { %v3536_v44 = vpop.f32.mrb[6].mxu1  ;;  %v399_v40 = vadd.s32 11, %v3623_v61 }
 0x1a2   : > { %v2471_v47 = vpop.f32.mrb[7].mxu1 }
 0x1a3   : > { %v3649_v47 = vmul.u32.u64.low 3123612579, %v3627_v24  ;;  %v3650_v14 = vmul.u32.u64.high 3123612579, %v3627_v24, %v3649_v47  ;;  %v412_v38 = vsel %vm3652_vm10, %v399_v40, %v3623_v61 }
 0x1a4   : > { %vm3702_vm0 = vcmp.lt.s32.totalorder %v412_v38, 9 }
 0x1a5   : > { %v318_v3 = vshrl.u32 %v3650_v14, 3 }
 0x1a7   : > { %v3549_v62 = vpop.f32.mrb[8].mxu1  ;;  %v319_v37 = vmul.u32 11, %v318_v3 }
 0x1a8   : > { %v2474_v53 = vpop.f32.mrb[9].mxu1 }
 0x1a9   : > { %v3558_v4 = vpop.f32.mrb[10].mxu1  ;;  %v297_v53 = vmul.u32 11, %v296_v22  ;;  %v329_v22 = vshrl.u32 %v3682_v31, 3 }
 0x1aa   : > { %v2475_v13 = vpop.f32.mrb[11].mxu1 }
 0x1ab   : > { %v298_v29 = vsub.s32 %v3564_v11, %v297_v53  ;;  %v308_v11 = vmul.u32 11, %v307_v27 }
 0x1ad   : > { %vm363_vm3 = vcmp.ne.s32.totalorder %v298_v29, 0  ;;  %v309_v40 = vsub.s32 %v3597_v42, %v308_v11 }
 0x1af   : > { %v3588_v2 = vpop.f32.mrb[12].mxu1  ;;  %vm364_vm8 = vcmp.ne.s32.totalorder %v309_v40, 0  ;;  %vm377_vm9 = vcmp.lt.s32.totalorder %v309_v40, 0  ;;  %v403_v23 = vadd.s32 11, %v309_v40 }
 0x1b0   : > { %v2478_v41 = vpop.f32.mrb[13].mxu1 }
 0x1b1   : > { %v3599_v35 = vpop.f32.mrb[14].mxu1  ;;  %v3692_v41 = vadd.s32 96, %v3507_v45 }
 0x1b2   : > { %v2479_v55 = vpop.f32.mrb[15].mxu1  ;;  %v1925_v57 = vpop.f32.mrb[0].mxu0 }
 0x1b3   : > { %v2644_v1 = vadd.f32 %v1925_v57, %v3515_v7  ;;  %v2616_v10 = vpop.f32.mrb[1].mxu0  ;;  %v410_v7 = vsel %vm3605_vm4, %v397_v50, %v3560_v49  ;;  %v3699_v43 = vmul.u32.u64.low 3123612579, %v3669_v18  ;;  %v3700_v50 = vmul.u32.u64.high 3123612579, %v3669_v18, %v3699_v43 }
 0x1b4   : > { %v1928_v28 = vpop.f32.mrb[2].mxu0  ;;  %vm3659_vm11 = vcmp.lt.s32.totalorder %v410_v7, 9  ;;  %v401_v10 = vadd.s32 11, %v287_v19  ;;  %vm376_vm4 = vcmp.lt.s32.totalorder %v298_v29, 0 }
 0x1b5   : > { %1992 = vst [vmem:[%s3614_s16] sm:$0xff] %v2644_v1  ;;  %v2031_v54 = vsel %vm421_vm5, %v2644_v1, 0.0  ;;  %v2645_v32 = vadd.f32 %v1928_v28, %v3521_v25  ;;  %v2617_v39 = vpop.f32.mrb[3].mxu0  ;;  %v276_v25 = vsub.s32 %v3546_v56, %v275_v15 }
 0x1b6   : > { %v2063_v60 = vmul.f32 %v2644_v1, %v2031_v54  ;;  %v3709_v15 = vmul.u32.u64.low 3123612579, %v3692_v41  ;;  %v3710_v28 = vmul.u32.u64.high 3123612579, %v3692_v41, %v3709_v15  ;;  %v402_v39 = vadd.s32 11, %v298_v29 }
 0x1b7   : > { %1993 = vst [vmem:[%s3614_s16 + $0x8] sm:$0xff] %v2645_v32  ;;  %v2032_v46 = vsel %vm422_vm7, %v2645_v32, 0.0  ;;  %vm361_vm13 = vcmp.ne.s32.totalorder %v276_v25, 0  ;;  %vm374_vm14 = vcmp.lt.s32.totalorder %v276_v25, 0  ;;  %v400_v16 = vadd.s32 11, %v276_v25  ;;  %vm3727_vm7 = vmand %vm376_vm4, %vm363_vm3 }
 0x1b8   : > { %v2044_v17 = vadd.f32 %v2032_v46, %v2031_v54  ;;  %v2064_v6 = vmul.f32 %v2645_v32, %v2032_v46  ;;  %vm3686_vm15 = vmand %vm374_vm14, %vm361_vm13  ;;  %v415_v26 = vsel %vm3727_vm7, %v402_v39, %v298_v29  ;;  %v351_v53 = vshrl.u32 %v3710_v28, 3 }
 0x1b9   : > { %v413_v45 = vsel %vm3686_vm15, %v400_v16, %v276_v25  ;;  %vm428_vm13 = vcmp.lt.s32.totalorder %v415_v26, 9  ;;  %vm3741_vm14 = vmand %vm377_vm9, %vm364_vm8 }
 0x1ba   : > { %v2076_v0 = vadd.f32 %v2064_v6, %v2063_v60  ;;  %v1933_v56 = vpop.f32.mrb[4].mxu0  ;;  %vm426_vm5 = vcmp.lt.s32.totalorder %v413_v45, 9  ;;  %v414_v60 = vsel %vm3715_vm6, %v401_v10, %v287_v19  ;;  %v352_v31 = vmul.u32 11, %v351_v53 }
 0x1bb   : > { %v2646_v49 = vadd.f32 %v1933_v56, %v3533_v48  ;;  %v2620_v13 = vpop.f32.mrb[5].mxu0  ;;  %vm427_vm10 = vcmp.lt.s32.totalorder %v414_v60, 9  ;;  %v416_v34 = vsel %vm3741_vm14, %v403_v23, %v309_v40 }
 0x1bc   : > { %v1936_v12 = vpop.f32.mrb[6].mxu0  ;;  %vm429_vm2 = vcmp.lt.s32.totalorder %v416_v34, 9  ;;  %v353_v8 = vsub.s32 %v3692_v41, %v352_v31 }
 0x1bd   : > { %1994 = vst [vmem:[%s3614_s16 + $0x10] sm:$0xff] %v2646_v49  ;;  %v2033_v48 = vsel %vm3659_vm11, %v2646_v49, 0.0  ;;  %v2647_v58 = vadd.f32 %v1936_v12, %v3536_v44  ;;  %v2621_v59 = vpop.f32.mrb[7].mxu0 }
 0x1be   : > { %v2045_v52 = vadd.f32 %v2044_v17, %v2033_v48  ;;  %v2065_v20 = vmul.f32 %v2646_v49, %v2033_v48  ;;  %v340_v17 = vshrl.u32 %v3700_v50, 3  ;;  %vm368_vm8 = vcmp.ne.s32.totalorder %v353_v8, 0 }
 0x1bf   : > { %1995 = vst [vmem:[%s3614_s16 + $0x18] sm:$0xff] %v2647_v58  ;;  %v2034_v44 = vsel %vm3663_vm12, %v2647_v58, 0.0  ;;  %vm381_vm9 = vcmp.lt.s32.totalorder %v353_v8, 0 }
 0x1c0   : > { %v2077_v51 = vadd.f32 %v2076_v0, %v2065_v20  ;;  %v2046_v55 = vadd.f32 %v2045_v52, %v2034_v44  ;;  %v2066_v57 = vmul.f32 %v2647_v58, %v2034_v44  ;;  %v330_v0 = vmul.u32 11, %v329_v22 }
 0x1c1   : > { %v341_v13 = vmul.u32 11, %v340_v17 }
 0x1c2   : > { %v2078_v61 = vadd.f32 %v2077_v51, %v2066_v57  ;;  %v1941_v1 = vpop.f32.mrb[8].mxu0 }
 0x1c3   : > { %v2648_v30 = vadd.f32 %v1941_v1, %v3549_v62  ;;  %v2624_v36 = vpop.f32.mrb[9].mxu0  ;;  %v342_v29 = vsub.s32 %v3669_v18, %v341_v13 }
 0x1c4   : > { %v1944_v54 = vpop.f32.mrb[10].mxu0 }
 0x1c5   : > { %1996 = vst [vmem:[%s3614_s16 + $0x20] sm:$0xff] %v2648_v30  ;;  %v2035_v7 = vsel %vm3702_vm0, %v2648_v30, 0.0  ;;  %v2649_v62 = vadd.f32 %v1944_v54, %v3558_v4  ;;  %v2625_v21 = vpop.f32.mrb[11].mxu0  ;;  %v320_v4 = vsub.s32 %v3627_v24, %v319_v37  ;;  %vm367_vm3 = vcmp.ne.s32.totalorder %v342_v29, 0 }
 0x1c6   : > { %v2047_v46 = vadd.f32 %v2046_v55, %v2035_v7  ;;  %v2067_v25 = vmul.f32 %v2648_v30, %v2035_v7  ;;  %vm380_vm4 = vcmp.lt.s32.totalorder %v342_v29, 0  ;;  %v406_v30 = vadd.s32 11, %v342_v29 }
 0x1c7   : > { %1997 = vst [vmem:[%s3614_s16 + $0x28] sm:$0xff] %v2649_v62  ;;  %v2036_v14 = vsel %vm426_vm5, %v2649_v62, 0.0  ;;  %vm365_vm11 = vcmp.ne.s32.totalorder %v320_v4, 0  ;;  %vm378_vm12 = vcmp.lt.s32.totalorder %v320_v4, 0  ;;  %v404_v48 = vadd.s32 11, %v320_v4  ;;  %vm3764_vm7 = vmand %vm380_vm4, %vm367_vm3 }
 0x1c8   : > { %v2079_v42 = vadd.f32 %v2078_v61, %v2067_v25  ;;  %v2048_v6 = vadd.f32 %v2047_v46, %v2036_v14  ;;  %v2068_v5 = vmul.f32 %v2649_v62, %v2036_v14  ;;  %vm3748_vm15 = vmand %vm378_vm12, %vm365_vm11  ;;  %v407_v46 = vadd.s32 11, %v353_v8 }
 0x1c9   : > { %v417_v50 = vsel %vm3748_vm15, %v404_v48, %v320_v4  ;;  %v419_v47 = vsel %vm3764_vm7, %v406_v30, %v342_v29 }
 0x1ca   : > { %v2080_v9 = vadd.f32 %v2079_v42, %v2068_v5  ;;  %v1949_v56 = vpop.f32.mrb[12].mxu0  ;;  %vm430_vm5 = vcmp.lt.s32.totalorder %v417_v50, 9  ;;  %vm432_vm12 = vcmp.lt.s32.totalorder %v419_v47, 9 }
 0x1cb   : > { %v2650_v24 = vadd.f32 %v1949_v56, %v3588_v2  ;;  %v2628_v49 = vpop.f32.mrb[13].mxu0  ;;  %v331_v2 = vsub.s32 %v3657_v63, %v330_v0 }
 0x1cc   : > { %v1952_v12 = vpop.f32.mrb[14].mxu0 }
 0x1cd   : > { %1998 = vst [vmem:[%s3614_s16 + $0x30] sm:$0xff] %v2650_v24  ;;  %v2037_v16 = vsel %vm427_vm10, %v2650_v24, 0.0  ;;  %v2651_v19 = vadd.f32 %v1952_v12, %v3599_v35  ;;  %v2629_v27 = vpop.f32.mrb[15].mxu0  ;;  %vm366_vm0 = vcmp.ne.s32.totalorder %v331_v2, 0  ;;  %vm379_vm1 = vcmp.lt.s32.totalorder %v331_v2, 0  ;;  %vm3773_vm10 = vmand %vm381_vm9, %vm368_vm8 }
 0x1ce   : > { %v2049_v58 = vadd.f32 %v2048_v6, %v2037_v16  ;;  %v2069_v59 = vmul.f32 %v2650_v24, %v2037_v16  ;;  %v405_v18 = vadd.s32 11, %v331_v2  ;;  %vm3759_vm6 = vmand %vm379_vm1, %vm366_vm0  ;;  %v420_v26 = vsel %vm3773_vm10, %v407_v46, %v353_v8 }
 0x1cf   : > { %1999 = vst [vmem:[%s3614_s16 + $0x38] sm:$0xff] %v2651_v19  ;;  %v2038_v52 = vsel %vm428_vm13, %v2651_v19, 0.0  ;;  %v1270_v20 = vpop.f32.mrb[16].mxu1  ;;  %vm212_vm13 = vcmp.lt.s32.totalorder %v3692_v41, 99  ;;  %vm433_vm14 = vcmp.lt.s32.totalorder %v420_v26, 9  ;;  %vm2095_vm0 = vcmask 1040384  }
 0x1d0   : > { %v2081_v35 = vadd.f32 %v2080_v9, %v2069_v59  ;;  %v2050_v44 = vadd.f32 %v2049_v58, %v2038_v52  ;;  %v2070_v3 = vmul.f32 %v2651_v19, %v2038_v52  ;;  %v2512_v43 = vpop.f32.mrb[17].mxu1  ;;  %v418_v7 = vsel %vm3759_vm6, %v405_v18, %v331_v2  ;;  %vm446_vm15 = vmand %vm212_vm13, %vm433_vm14 }
 0x1d1   : > { %v1273_v63 = vpop.f32.mrb[18].mxu1  ;;  %vm431_vm11 = vcmp.lt.s32.totalorder %v418_v7, 9 }
 0x1d2   : > { %v2082_v51 = vadd.f32 %v2081_v35, %v2070_v3  ;;  %v2513_v55 = vpop.f32.mrb[19].mxu1  ;;  %v1957_v57 = vpop.f32.mrb[16].mxu0 }
 0x1d3   : > { %v2652_v45 = vadd.f32 %v1957_v57, %v1270_v20  ;;  %v2632_v11 = vpop.f32.mrb[17].mxu0 }
 0x1d4   : > { %v1960_v61 = vpop.f32.mrb[18].mxu0 }
 0x1d5   : > { %2000 = vst [vmem:[%s3614_s16 + $0x40] sm:$0xff] %v2652_v45  ;;  %v2039_v10 = vsel %vm429_vm2, %v2652_v45, 0.0  ;;  %v2653_v15 = vadd.f32 %v1960_v61, %v1273_v63  ;;  %v2633_v28 = vpop.f32.mrb[19].mxu0 }
 0x1d6   : > { %v2051_v36 = vadd.f32 %v2050_v44, %v2039_v10  ;;  %v2071_v37 = vmul.f32 %v2652_v45, %v2039_v10 }
 0x1d7   : > { %2001 = vst [vmem:[%s3614_s16 + $0x48] sm:$0xff] %v2653_v15  ;;  %v2040_v32 = vsel %vm430_vm5, %v2653_v15, 0.0  ;;  %v1278_v39 = vpop.f32.mrb[20].mxu1 }
 0x1d8   : > { %v2083_v62 = vadd.f32 %v2082_v51, %v2071_v37  ;;  %v2052_v21 = vadd.f32 %v2051_v36, %v2040_v32  ;;  %v2072_v40 = vmul.f32 %v2653_v15, %v2040_v32  ;;  %v2516_v22 = vpop.f32.mrb[21].mxu1 }
 0x1d9   : > { %v1281_v25 = vpop.f32.mrb[22].mxu1 }
 0x1da   : > { %v2084_v60 = vadd.f32 %v2083_v62, %v2072_v40  ;;  %v2517_v4 = vpop.f32.mrb[23].mxu1  ;;  %v1965_v17 = vpop.f32.mrb[20].mxu0 }
 0x1db   : > { %v2654_v42 = vadd.f32 %v1965_v17, %v1278_v39  ;;  %v2636_v6 = vpop.f32.mrb[21].mxu0 }
 0x1dc   : > { %v1968_v5 = vpop.f32.mrb[22].mxu0 }
 0x1dd   : > { %2002 = vst [vmem:[%s3614_s16 + $0x50] sm:$0xff] %v2654_v42  ;;  %v2041_v0 = vsel %vm431_vm11, %v2654_v42, 0.0  ;;  %v2655_v9 = vadd.f32 %v1968_v5, %v1281_v25  ;;  %v2637_v56 = vpop.f32.mrb[23].mxu0 }
 0x1de   : > { %v2053_v23 = vadd.f32 %v2052_v21, %v2041_v0  ;;  %v2073_v53 = vmul.f32 %v2654_v42, %v2041_v0 }
 0x1df   : > { %2003 = vst [vmem:[%s3614_s16 + $0x58] sm:$0xff] %v2655_v9  ;;  %v2042_v24 = vsel %vm432_vm12, %v2655_v9, 0.0  ;;  %v1286_v49 = vpop.f32.mrb[24].mxu1 }
 0x1e0   : > { %v2085_v13 = vadd.f32 %v2084_v60, %v2073_v53  ;;  %v2054_v12 = vadd.f32 %v2053_v23, %v2042_v24  ;;  %v2074_v38 = vmul.f32 %v2655_v9, %v2042_v24  ;;  %v2520_v16 = vpop.f32.mrb[25].mxu1 }
 0x1e1   : > { %v1289_v19 = vpop.f32.mrb[26].mxu1 }
 0x1e2   : > { %v2086_v27 = vadd.f32 %v2085_v13, %v2074_v38  ;;  %v2521_v48 = vpop.f32.mrb[27].mxu1  ;;  %v1973_v2 = vpop.f32.mrb[24].mxu0 }
 0x1e3   : > { %v2656_v58 = vadd.f32 %v1973_v2, %v1286_v49  ;;  %v2640_v59 = vpop.f32.mrb[25].mxu0 }
 0x1e4   : > { %v1976_v33 = vpop.f32.mrb[26].mxu0 }
 0x1e5   : > { %2004 = vst [vmem:[%s3614_s16 + $0x60] sm:$0xff] %v2656_v58  ;;  %v2043_v31 = vsel %vm446_vm15, %v2656_v58, 0.0  ;;  %v2641_v52 = vpop.f32.mrb[27].mxu0 }
 0x1e6   : > { %v2055_v20 = vadd.f32 %v2054_v12, %v2043_v31  ;;  %v2075_v41 = vmul.f32 %v2656_v58, %v2043_v31 }
 0x1e8   : > { %v2056_v34 = vrot.slane %v2055_v20, 4  ;;  %v2087_v29 = vadd.f32 %v2086_v27, %v2075_v41 }
 0x1ea   : > { %v2057_v35 = vadd.f32 %v2056_v34, %v2055_v20  ;;  %v2088_v44 = vrot.slane %v2087_v29, 4 }
 0x1ec   : > { %v2058_v3 = vrot.slane %v2057_v35, 2  ;;  %v2089_v43 = vadd.f32 %v2088_v44, %v2087_v29 }
 0x1ee   : > { %v2059_v63 = vadd.f32 %v2058_v3, %v2057_v35  ;;  %v2090_v50 = vrot.slane %v2089_v43, 2 }
 0x1f0   : > { %v2060_v51 = vrot.slane %v2059_v63, 1  ;;  %v2091_v55 = vadd.f32 %v2090_v50, %v2089_v43 }
 0x1f2   : > { %v2092_v57 = vrot.slane %v2091_v55, 1  ;;  %v2061_v8 = vadd.f32 %v2060_v51, %v2059_v63 }
 0x1f4   : > { %v2093_v45 = vadd.f32 %v2092_v57, %v2091_v55 }
 0x1f6   : > { %v2096_v11 = vsel %vm2095_vm0, %v2061_v8, %v2093_v45 }
 0x1f7   : > { %2097 = vst [vmem:[%s184_s20] sm:$0x3] %v2096_v11 }
 0x1f8 PF: > { %s14_s12 = sadd.s32 1, %s2928_s12  }
 0x1f9   : > { %p11_p6 = scmp.ge.s32.totalorder %s14_s12, 6  }
 0x1fb   :  { %13 = sbr.rel (!%p11_p6) target bundleno = 1 (0x1), region = 78 }

</bundles_post_ra>
